<compile_context>
chip_gen: v7x
topology: tpu7x:2x2x1
jax: 0.10.0
libtpu: 0.0.40
codegen_flags: <defaults>
</compile_context>

<pallas_src>
import functools
import math

import jax
import jax.numpy as jnp
from jax.experimental import pallas as pl
from jax.experimental.pallas import tpu as pltpu

F32 = jnp.float32
BF16 = jnp.bfloat16


# ---------------------------------------------------------------------------
# Kernel 1: per-node precompute
#   node_mapper GVLinear, node_sca_sca/node_sca_vec/node_vec_vec projections,
#   resi_connecter GVLinear.  Vector features arrive xyz-stacked as [3N, C].
# ---------------------------------------------------------------------------
def _node_kernel(sca_ref, vec_ref,
                 nm_wv1, nm_wsn, nm_wss, nm_wv2,
                 wnss, bnss, wnsv, bnsv, wnvv,
                 rc_wv1, rc_wsn, rc_wss, rc_wv2,
                 nss_o, nsv_o, nvv_o, rsca_o, rvec_o):
    n = sca_ref.shape[0]
    sca_b = sca_ref[...].astype(BF16)
    vec_b = vec_ref[...].astype(BF16)                       # [3N, Cv]

    def gvlinear(wv1, wsn, wss, wv2):
        h = jnp.dot(vec_b, wv1[...], preferred_element_type=F32)        # [3N, H]
        nrm = jnp.sqrt(h[0:n] ** 2 + h[n:2 * n] ** 2 + h[2 * n:3 * n] ** 2)
        out_s = (jnp.dot(nrm.astype(BF16), wsn[...], preferred_element_type=F32) +
                 jnp.dot(sca_b, wss[...], preferred_element_type=F32))
        out_v = jnp.dot(h.astype(BF16), wv2[...], preferred_element_type=F32)
        return out_s, out_v

    nsca_m, nvec_m = gvlinear(nm_wv1, nm_wsn, nm_wss, nm_wv2)
    nsca_b = nsca_m.astype(BF16)
    nss_o[...] = jnp.dot(nsca_b, wnss[...], preferred_element_type=F32) + bnss[...]
    nsv_o[...] = jnp.dot(nsca_b, wnsv[...], preferred_element_type=F32) + bnsv[...]
    nvv_o[...] = jnp.dot(nvec_m.astype(BF16), wnvv[...], preferred_element_type=F32)

    rsca, rvec = gvlinear(rc_wv1, rc_wsn, rc_wss, rc_wv2)
    rsca_o[...] = rsca
    rvec_o[...] = rvec


def _node_precompute(node_sca, node_vec_st, p):
    n = node_sca.shape[0]
    hid = p["node_sca_sca"]["w"].shape[1]
    nm, rc = p["node_mapper"], p["resi_connecter"]
    ns_out = nm["wsn"].shape[1]
    nv_out = nm["wv2"].shape[1]
    b16 = lambda x: x.astype(BF16)

    weights = [b16(nm["wv1"]), b16(nm["wsn"]), b16(nm["wss"]), b16(nm["wv2"]),
               b16(p["node_sca_sca"]["w"]), p["node_sca_sca"]["b"],
               b16(p["node_sca_vec"]["w"]), p["node_sca_vec"]["b"],
               b16(p["node_vec_vec"]["w"]),
               b16(rc["wv1"]), b16(rc["wsn"]), b16(rc["wss"]), b16(rc["wv2"])]
    cspec = lambda a: pl.BlockSpec(a.shape, lambda i: (0, 0))

    return pl.pallas_call(
        _node_kernel,
        grid=(1,),
        in_specs=[cspec(node_sca), cspec(node_vec_st)] + [cspec(w) for w in weights],
        out_specs=[pl.BlockSpec((n, hid), lambda i: (0, 0)),
                   pl.BlockSpec((n, hid), lambda i: (0, 0)),
                   pl.BlockSpec((3 * n, hid), lambda i: (0, 0)),
                   pl.BlockSpec((n, ns_out), lambda i: (0, 0)),
                   pl.BlockSpec((3 * n, nv_out), lambda i: (0, 0))],
        out_shape=[jax.ShapeDtypeStruct((n, hid), F32),
                   jax.ShapeDtypeStruct((n, hid), F32),
                   jax.ShapeDtypeStruct((3 * n, hid), F32),
                   jax.ShapeDtypeStruct((n, ns_out), F32),
                   jax.ShapeDtypeStruct((3 * n, nv_out), F32)],
        compiler_params=pltpu.CompilerParams(dimension_semantics=("arbitrary",)),
    )(node_sca, node_vec_st, *weights)


# ---------------------------------------------------------------------------
# Kernel 2: edge messages + scatter-sum + residual + aggr_out GVLinear.
#   The edge grid axis is a reduction; aggregates live in VMEM scratch and the
#   final outputs are written only on the last grid step.
# ---------------------------------------------------------------------------
def _edge_kernel(row_ref, col_ref, gds_ref, ef_ref,
                 pos_ref, nss_ref, nsv_ref, nvv_ref, rsca_ref, rvec_ref,
                 off_ref, gsn_ref, gevv_ref,
                 wss_sm, wss_ef, wess, bess, wesv, besv,
                 mo_wv1, mo_wsn, mo_wss, mo_wv2,
                 ao_wv1, ao_wsn, ao_wss, ao_wv2,
                 osca_ref, ovec_ref,
                 acc_sca, acc_vec, mv_buf, *, cutoff, gcoeff):
    te = row_ref.shape[0]
    n = nss_ref.shape[0]

    @pl.when(pl.program_id(0) == 0)
    def _init():
        acc_sca[...] = jnp.zeros_like(acc_sca)
        acc_vec[...] = jnp.zeros_like(acc_vec)

    # one-hot edge->node matrices (shared by geometry gather, feature gather
    # and the scatter_sum).
    iota_n = jax.lax.broadcasted_iota(jnp.int32, (te, n), 1)
    oh_row = (row_ref[...] == iota_n).astype(F32)                       # [TE, N]
    oh_col = (col_ref[...] == iota_n).astype(F32)
    oh_row_b = oh_row.astype(BF16)

    # edge geometry: ev = pos[row] - pos[col]; EdgeMapping normalization.
    ev = jnp.dot(oh_row - oh_col, pos_ref[...], preferred_element_type=F32)  # [TE, 3]
    evn = jnp.sqrt(jnp.sum(ev * ev, axis=-1, keepdims=True))
    inv = pl.reciprocal(evn + 1e-7, approx=True)
    u = ev * inv                                                        # direction
    unorm = evn * inv                                                   # |ev|/(|ev|+eps)

    # GaussianSmearing + cosine cutoff (EUP ops, hide under MXU work).
    gds = gds_ref[...]                                                  # [TE, 1]
    smear = jnp.exp(gcoeff * (gds - off_ref[...]) ** 2)                 # [TE, n_gauss]
    coeff = 0.5 * (jnp.cos(gds * (math.pi / cutoff)) + 1.0)
    coeff = coeff * (gds <= cutoff).astype(F32) * (gds >= 0.0).astype(F32)

    # edge_mapper GVLinear with the rank-1 edge expansion folded at trace time:
    #   e_sca = unorm * gsn + [smear | edge_feat] @ em_wss
    #   edge_vec_vec(e_vec)[.,hid,d] = u[.,d] * gevv[hid]
    e_sca = (unorm * gsn_ref[...] +
             jnp.dot(smear.astype(BF16), wss_sm[...], preferred_element_type=F32) +
             jnp.dot(ef_ref[...].astype(BF16), wss_ef[...], preferred_element_type=F32))
    e_sca_b = e_sca.astype(BF16)
    ess = jnp.dot(e_sca_b, wess[...], preferred_element_type=F32) + bess[...]
    esv = jnp.dot(e_sca_b, wesv[...], preferred_element_type=F32) + besv[...]

    # in-kernel gather of the per-node projections via the shared one-hot.
    nss_r = jnp.dot(oh_row_b, nss_ref[...].astype(BF16), preferred_element_type=F32)
    nsv_r = jnp.dot(oh_row_b, nsv_ref[...].astype(BF16), preferred_element_type=F32)

    msg_sca = nss_r * ess * coeff                                       # [TE, hid]

    gevv = gevv_ref[...]                                                # [1, hid]
    for d in range(3):
        nvv_rd = jnp.dot(oh_row_b, nvv_ref[d * n:(d + 1) * n, :].astype(BF16),
                         preferred_element_type=F32)
        mv_buf[d * te:(d + 1) * te, :] = (nvv_rd * esv +
                                          nsv_r * (u[:, d:d + 1] * gevv)) * coeff

    # msg_out GVLinear with xyz stacked into single matmuls.
    m_inter = jnp.dot(mv_buf[...].astype(BF16), mo_wv1[...],
                      preferred_element_type=F32)                        # [3TE, hid]
    m_norm = jnp.sqrt(m_inter[0:te] ** 2 + m_inter[te:2 * te] ** 2 +
                      m_inter[2 * te:3 * te] ** 2)
    out_msg_sca = (jnp.dot(m_norm.astype(BF16), mo_wsn[...], preferred_element_type=F32) +
                   jnp.dot(msg_sca.astype(BF16), mo_wss[...], preferred_element_type=F32))
    out_msg_vec = jnp.dot(m_inter.astype(BF16), mo_wv2[...],
                          preferred_element_type=F32)                    # [3TE, Cv_out]

    # scatter_sum over destination nodes = one-hot^T contraction on the MXU.
    dn = (((0,), (0,)), ((), ()))
    acc_sca[...] = acc_sca[...] + jax.lax.dot_general(
        oh_row_b, out_msg_sca.astype(BF16), dn, preferred_element_type=F32)
    for d in range(3):
        acc_vec[d * n:(d + 1) * n, :] = acc_vec[d * n:(d + 1) * n, :] + \
            jax.lax.dot_general(oh_row_b, out_msg_vec[d * te:(d + 1) * te].astype(BF16),
                                dn, preferred_element_type=F32)

    # last grid step: residual add + aggr_out GVLinear -> final outputs.
    @pl.when(pl.program_id(0) == pl.num_programs(0) - 1)
    def _finalize():
        pre_sca = acc_sca[...] + rsca_ref[...]
        pre_vec = acc_vec[...] + rvec_ref[...]
        h = jnp.dot(pre_vec.astype(BF16), ao_wv1[...], preferred_element_type=F32)
        nrm = jnp.sqrt(h[0:n] ** 2 + h[n:2 * n] ** 2 + h[2 * n:3 * n] ** 2)
        osca_ref[...] = (jnp.dot(nrm.astype(BF16), ao_wsn[...], preferred_element_type=F32) +
                         jnp.dot(pre_sca.astype(BF16), ao_wss[...], preferred_element_type=F32))
        ovec_ref[...] = jnp.dot(h.astype(BF16), ao_wv2[...], preferred_element_type=F32)


# ---------------------------------------------------------------------------
# Full forward (wrapper: layout conversion, trace-time weight folding, padding)
# ---------------------------------------------------------------------------
def geodesic_gnn_forward(params, node_sca, node_vec, node_pos, edge_feature,
                         edge_index, gds_dist, *, cutoff=10.0, tile_e=None):
    p = params
    n = node_sca.shape[0]
    cv = node_vec.shape[1]
    e = gds_dist.shape[0]
    hid = p["node_sca_sca"]["w"].shape[1]
    out_s = p["aggr_out"]["wsn"].shape[1]
    out_v = p["aggr_out"]["wv2"].shape[1]
    msg_s = p["msg_out"]["wsn"].shape[1]
    msg_v = p["msg_out"]["wv2"].shape[1]
    b16 = lambda x: x.astype(BF16)
    hp = dict(precision=jax.lax.Precision.HIGHEST)

    # stack vector features by xyz component: [N, Cv, 3] -> [3N, Cv]
    vec_st = jnp.transpose(node_vec, (2, 0, 1)).reshape(3 * n, cv).astype(F32)

    # ---- kernel 1: node-side precompute -----------------------------------
    nss, nsv, nvv_st, resi_sca, resi_vec_st = _node_precompute(
        node_sca.astype(F32), vec_st, p)

    # ---- fold the rank-1 EdgeMapping through edge_mapper / edge_vec_vec ----
    wexp = p["edge_expansion"]["w"][0]                                  # [edge_dim]
    em = p["edge_mapper"]
    g1 = jnp.dot(wexp, em["wv1"], **hp)                                 # [H_e]
    gsn = jnp.dot(jnp.abs(g1), em["wsn"], **hp)[None, :]                # [1, node_sca]
    gevv = jnp.dot(jnp.dot(g1, em["wv2"], **hp),
                   p["edge_vec_vec"]["w"], **hp)[None, :]               # [1, hid]
    offsets = p["gaussian_offsets"][None, :].astype(F32)                # [1, n_gauss]
    ng = offsets.shape[1]
    wss_sm, wss_ef = em["wss"][:ng], em["wss"][ng:]

    # ---- pad edges to a tile multiple (padded edges have coeff == 0) -------
    row = edge_index[0].astype(jnp.int32)
    col = edge_index[1].astype(jnp.int32)
    gds = gds_dist.astype(F32)
    ef = edge_feature.astype(F32)
    if tile_e is None:
        tile_e = e if e <= 1024 else 512
    e_pad = -(-e // tile_e) * tile_e
    if e_pad != e:
        pad = e_pad - e
        row = jnp.concatenate([row, jnp.zeros((pad,), jnp.int32)])
        col = jnp.concatenate([col, jnp.zeros((pad,), jnp.int32)])
        gds = jnp.concatenate([gds, jnp.full((pad,), 2.0 * cutoff, F32)])
        ef = jnp.concatenate([ef, jnp.zeros((pad, ef.shape[1]), F32)])

    edge_in = [row[:, None], col[:, None], gds[:, None], ef]
    node_in = [node_pos.astype(F32), nss, nsv, nvv_st, resi_sca, resi_vec_st]
    const_in = [offsets, gsn.astype(F32), gevv.astype(F32),
                b16(wss_sm), b16(wss_ef),
                b16(p["edge_sca_sca"]["w"]), p["edge_sca_sca"]["b"],
                b16(p["edge_sca_vec"]["w"]), p["edge_sca_vec"]["b"],
                b16(p["msg_out"]["wv1"]), b16(p["msg_out"]["wsn"]),
                b16(p["msg_out"]["wss"]), b16(p["msg_out"]["wv2"]),
                b16(p["aggr_out"]["wv1"]), b16(p["aggr_out"]["wsn"]),
                b16(p["aggr_out"]["wss"]), b16(p["aggr_out"]["wv2"])]

    edge_specs = [pl.BlockSpec((tile_e, a.shape[1]), lambda i: (i, 0)) for a in edge_in]
    const_specs = [pl.BlockSpec(a.shape, lambda i: (0, 0)) for a in node_in + const_in]

    kernel = functools.partial(_edge_kernel, cutoff=float(cutoff),
                               gcoeff=float(p["gaussian_coeff"]))
    out_sca, out_vec_st = pl.pallas_call(
        kernel,
        grid=(e_pad // tile_e,),
        in_specs=edge_specs + const_specs,
        out_specs=[pl.BlockSpec((n, out_s), lambda i: (0, 0)),
                   pl.BlockSpec((3 * n, out_v), lambda i: (0, 0))],
        out_shape=[jax.ShapeDtypeStruct((n, out_s), F32),
                   jax.ShapeDtypeStruct((3 * n, out_v), F32)],
        scratch_shapes=[pltpu.VMEM((n, msg_s), F32),
                        pltpu.VMEM((3 * n, msg_v), F32),
                        pltpu.VMEM((3 * tile_e, hid), F32)],
        compiler_params=pltpu.CompilerParams(
            dimension_semantics=("arbitrary",)),   # edge axis is a reduction
    )(*edge_in, *node_in, *const_in)

    return out_sca, out_vec_st.reshape(3, n, out_v).transpose(1, 2, 0)  # [N,256],[N,64,3]


# ---------------------------------------------------------------------------
# Deterministic parameter init (shapes from Geodesic_GNN.__init__ defaults)
# ---------------------------------------------------------------------------
def init_params(key, node_sca_dim=256, node_vec_dim=64, hid_dim=128, edge_dim=64,
                num_edge_types=2, out_sca_dim=256, out_vec_dim=64, cutoff=10.0):
    keys = iter(jax.random.split(key, 64))

    def w(shape, scale=0.1):
        return (scale * jax.random.normal(next(keys), shape)).astype(F32)

    def gv(in_s, in_v, out_s, out_v):
        h = max(in_v, out_v)
        return {"wv1": w((in_v, h)), "wsn": w((h, out_s)),
                "wss": w((in_s, out_s)), "wv2": w((h, out_v))}

    def lin(i, o):
        return {"w": w((i, o)), "b": w((1, o))}

    ng = edge_dim - num_edge_types
    offsets = jnp.linspace(0.0, cutoff, ng).astype(F32)
    gcoeff = -0.5 / float(offsets[1] - offsets[0]) ** 2
    return {
        "gaussian_offsets": offsets,
        "gaussian_coeff": gcoeff,
        "edge_expansion": {"w": w((1, edge_dim))},
        "node_mapper": gv(node_sca_dim, node_vec_dim, node_sca_dim, node_vec_dim),
        "edge_mapper": gv(edge_dim, edge_dim, node_sca_dim, node_vec_dim),
        "node_sca_sca": lin(node_sca_dim, hid_dim),
        "edge_sca_sca": lin(node_sca_dim, hid_dim),
        "edge_sca_vec": lin(node_sca_dim, hid_dim),
        "node_sca_vec": lin(node_sca_dim, hid_dim),
        "node_vec_vec": {"w": w((node_vec_dim, hid_dim))},
        "edge_vec_vec": {"w": w((node_vec_dim, hid_dim))},
        "msg_out": gv(hid_dim, hid_dim, out_sca_dim, out_vec_dim),
        "resi_connecter": gv(node_sca_dim, node_vec_dim, node_sca_dim, node_vec_dim),
        "aggr_out": gv(node_sca_dim, node_vec_dim, node_sca_dim, node_vec_dim),
    }


# ---------------------------------------------------------------------------
# Pure-JAX reference (PyTorch semantics, torch layout [N, C, 3] for vectors)
# ---------------------------------------------------------------------------
def reference_forward(params, node_sca, node_vec, node_pos, edge_feature,
                      edge_index, gds_dist, cutoff=10.0):
    hp = dict(precision=jax.lax.Precision.HIGHEST)

    def gv_ref(sca, vec, p):
        h = jnp.einsum("ncd,ch->nhd", vec, p["wv1"], **hp)
        norm = jnp.sqrt(jnp.sum(h * h, axis=-1))
        out_s = jnp.dot(norm, p["wsn"], **hp) + jnp.dot(sca, p["wss"], **hp)
        out_v = jnp.einsum("nhd,ho->nod", h, p["wv2"], **hp)
        return out_s, out_v

    def lin(x, p):
        return jnp.dot(x, p["w"], **hp) + p["b"]

    row, col = edge_index[0], edge_index[1]
    n = node_sca.shape[0]
    edge_vector = node_pos[row] - node_pos[col]
    smear = jnp.exp(params["gaussian_coeff"] *
                    (gds_dist[:, None] - params["gaussian_offsets"][None, :]) ** 2)
    edge_sca = jnp.concatenate([smear, edge_feature], -1)
    u = edge_vector / (jnp.linalg.norm(edge_vector, axis=1, keepdims=True) + 1e-7)
    edge_vec = u[:, None, :] * params["edge_expansion"]["w"][0][None, :, None]

    nsca, nvec = gv_ref(node_sca, node_vec, params["node_mapper"])
    esca, evec = gv_ref(edge_sca, edge_vec, params["edge_mapper"])
    nsca_r, nvec_r = nsca[row], nvec[row]

    coeff = 0.5 * (jnp.cos(gds_dist * jnp.pi / cutoff) + 1.0)
    coeff = coeff * (gds_dist <= cutoff) * (gds_dist >= 0.0)

    msg_sca = lin(nsca_r, params["node_sca_sca"]) * lin(esca, params["edge_sca_sca"])
    msg_sca = msg_sca * coeff[:, None]
    mv1 = (jnp.einsum("ncd,ch->nhd", nvec_r, params["node_vec_vec"]["w"], **hp) *
           lin(esca, params["edge_sca_vec"])[..., None])
    mv2 = (lin(nsca_r, params["node_sca_vec"])[..., None] *
           jnp.einsum("ncd,ch->nhd", evec, params["edge_vec_vec"]["w"], **hp))
    msg_vec = (mv1 + mv2) * coeff[:, None, None]
    msg_sca, msg_vec = gv_ref(msg_sca, msg_vec, params["msg_out"])

    aggr_sca = jax.ops.segment_sum(msg_sca, row, num_segments=n)
    aggr_vec = jax.ops.segment_sum(msg_vec, row, num_segments=n)
    resi_sca, resi_vec = gv_ref(node_sca, node_vec, params["resi_connecter"])
    return gv_ref(resi_sca + aggr_sca, resi_vec + aggr_vec, params["aggr_out"])


if __name__ == "__main__":
    key = jax.random.PRNGKey(0)
    kp, k1, k2, k3, k4, k5, k6 = jax.random.split(key, 7)

    N, E = 32, 256
    node_sca = 0.1 * jax.random.normal(k1, (N, 256), F32)
    node_vec = 0.1 * jax.random.normal(k2, (N, 64, 3), F32)
    node_pos = jax.random.normal(k3, (N, 3), F32)
    edge_feature = 0.1 * jax.random.normal(k4, (E, 2), F32)
    edge_index = jax.random.randint(k5, (2, E), 0, N, dtype=jnp.int32)
    gds_dist = jax.random.uniform(k6, (E,), F32, 0.0, 12.0)  # some beyond cutoff

    params = init_params(kp)

    out_sca, out_vec = geodesic_gnn_forward(params, node_sca, node_vec, node_pos,
                                            edge_feature, edge_index, gds_dist)
    jax.block_until_ready((out_sca, out_vec))

    ref_sca, ref_vec = reference_forward(params, node_sca, node_vec, node_pos,
                                         edge_feature, edge_index, gds_dist)
    assert out_sca.shape == (N, 256) and out_vec.shape == (N, 64, 3)

    # bf16 MXU operands (f32 accumulation) -> compare with a scale-normalized
    # max error; structural bugs produce errors 10-100x above this threshold.
    def rel_err(a, b):
        return float(jnp.max(jnp.abs(a - b)) / (jnp.max(jnp.abs(b)) + 1e-6))

    assert rel_err(out_sca, ref_sca) < 3e-2, "scalar output mismatch"
    assert rel_err(out_vec, ref_vec) < 3e-2, "vector output mismatch"

    print("KERNEL_OK")
</pallas_src>

<mosaic_0001>
module attributes {stable_mosaic.version = 11 : i64} {
  func.func @_node_kernel(%arg0: i32, %arg1: memref<32x256xf32, #tpu.memory_space<vmem>>, %arg2: memref<96x64xf32, #tpu.memory_space<vmem>>, %arg3: memref<64x64xbf16, #tpu.memory_space<vmem>>, %arg4: memref<64x256xbf16, #tpu.memory_space<vmem>>, %arg5: memref<256x256xbf16, #tpu.memory_space<vmem>>, %arg6: memref<64x64xbf16, #tpu.memory_space<vmem>>, %arg7: memref<256x128xbf16, #tpu.memory_space<vmem>>, %arg8: memref<1x128xf32, #tpu.memory_space<vmem>>, %arg9: memref<256x128xbf16, #tpu.memory_space<vmem>>, %arg10: memref<1x128xf32, #tpu.memory_space<vmem>>, %arg11: memref<64x128xbf16, #tpu.memory_space<vmem>>, %arg12: memref<64x64xbf16, #tpu.memory_space<vmem>>, %arg13: memref<64x256xbf16, #tpu.memory_space<vmem>>, %arg14: memref<256x256xbf16, #tpu.memory_space<vmem>>, %arg15: memref<64x64xbf16, #tpu.memory_space<vmem>>, %arg16: memref<32x128xf32, #tpu.memory_space<vmem>>, %arg17: memref<32x128xf32, #tpu.memory_space<vmem>>, %arg18: memref<96x128xf32, #tpu.memory_space<vmem>>, %arg19: memref<32x256xf32, #tpu.memory_space<vmem>>, %arg20: memref<96x64xf32, #tpu.memory_space<vmem>>) attributes {dimension_semantics = [#tpu.dimension_semantics<arbitrary>], iteration_bounds = array<i64: 1>, scalar_prefetch = 0 : i64, scratch_operands = 0 : i64, tpu.core_type = #tpu.core_type<tc>, window_params = [{pipeline_mode = #tpu.pipeline_mode<synchronous>, transform_indices = @transform_0, window_bounds = array<i64: 32, 256>}, {pipeline_mode = #tpu.pipeline_mode<synchronous>, transform_indices = @transform_1, window_bounds = array<i64: 96, 64>}, {pipeline_mode = #tpu.pipeline_mode<synchronous>, transform_indices = @transform_2, window_bounds = array<i64: 64, 64>}, {pipeline_mode = #tpu.pipeline_mode<synchronous>, transform_indices = @transform_3, window_bounds = array<i64: 64, 256>}, {pipeline_mode = #tpu.pipeline_mode<synchronous>, transform_indices = @transform_4, window_bounds = array<i64: 256, 256>}, {pipeline_mode = #tpu.pipeline_mode<synchronous>, transform_indices = @transform_5, window_bounds = array<i64: 64, 64>}, {pipeline_mode = #tpu.pipeline_mode<synchronous>, transform_indices = @transform_6, window_bounds = array<i64: 256, 128>}, {pipeline_mode = #tpu.pipeline_mode<synchronous>, transform_indices = @transform_7, window_bounds = array<i64: 1, 128>}, {pipeline_mode = #tpu.pipeline_mode<synchronous>, transform_indices = @transform_8, window_bounds = array<i64: 256, 128>}, {pipeline_mode = #tpu.pipeline_mode<synchronous>, transform_indices = @transform_9, window_bounds = array<i64: 1, 128>}, {pipeline_mode = #tpu.pipeline_mode<synchronous>, transform_indices = @transform_10, window_bounds = array<i64: 64, 128>}, {pipeline_mode = #tpu.pipeline_mode<synchronous>, transform_indices = @transform_11, window_bounds = array<i64: 64, 64>}, {pipeline_mode = #tpu.pipeline_mode<synchronous>, transform_indices = @transform_12, window_bounds = array<i64: 64, 256>}, {pipeline_mode = #tpu.pipeline_mode<synchronous>, transform_indices = @transform_13, window_bounds = array<i64: 256, 256>}, {pipeline_mode = #tpu.pipeline_mode<synchronous>, transform_indices = @transform_14, window_bounds = array<i64: 64, 64>}, {pipeline_mode = #tpu.pipeline_mode<synchronous>, transform_indices = @transform_15, window_bounds = array<i64: 32, 128>}, {pipeline_mode = #tpu.pipeline_mode<synchronous>, transform_indices = @transform_16, window_bounds = array<i64: 32, 128>}, {pipeline_mode = #tpu.pipeline_mode<synchronous>, transform_indices = @transform_17, window_bounds = array<i64: 96, 128>}, {pipeline_mode = #tpu.pipeline_mode<synchronous>, transform_indices = @transform_18, window_bounds = array<i64: 32, 256>}, {pipeline_mode = #tpu.pipeline_mode<synchronous>, transform_indices = @transform_19, window_bounds = array<i64: 96, 64>}]} {
    %c0 = arith.constant 0 : index
    %c0_0 = arith.constant 0 : index
    %0 = vector.load %arg1[%c0, %c0_0] : memref<32x256xf32, #tpu.memory_space<vmem>>, vector<32x256xf32>
    %1 = arith.truncf %0 : vector<32x256xf32> to vector<32x256xbf16>
    %c0_1 = arith.constant 0 : index
    %c0_2 = arith.constant 0 : index
    %2 = vector.load %arg2[%c0_1, %c0_2] : memref<96x64xf32, #tpu.memory_space<vmem>>, vector<96x64xf32>
    %3 = arith.truncf %2 : vector<96x64xf32> to vector<96x64xbf16>
    %c0_3 = arith.constant 0 : index
    %c0_4 = arith.constant 0 : index
    %4 = vector.load %arg3[%c0_3, %c0_4] : memref<64x64xbf16, #tpu.memory_space<vmem>>, vector<64x64xbf16>
    %cst = arith.constant dense<0.000000e+00> : vector<96x64xf32>
    %5 = tpu.matmul %3, %4, %cst {dimension_numbers = #tpu.dot_dimension_numbers<[1], [0], [0], [1], [0, 0, 1, 1], [], []>} : vector<96x64xbf16>, vector<64x64xbf16>, vector<96x64xf32> -> vector<96x64xf32>
    %6 = vector.extract_strided_slice %5 {offsets = [0, 0], sizes = [32, 64], strides = [1, 1]} : vector<96x64xf32> to vector<32x64xf32>
    %7 = arith.mulf %6, %6 : vector<32x64xf32>
    %8 = vector.extract_strided_slice %5 {offsets = [32, 0], sizes = [32, 64], strides = [1, 1]} : vector<96x64xf32> to vector<32x64xf32>
    %9 = arith.mulf %8, %8 : vector<32x64xf32>
    %10 = arith.addf %7, %9 : vector<32x64xf32>
    %11 = vector.extract_strided_slice %5 {offsets = [64, 0], sizes = [32, 64], strides = [1, 1]} : vector<96x64xf32> to vector<32x64xf32>
    %12 = arith.mulf %11, %11 : vector<32x64xf32>
    %13 = arith.addf %10, %12 : vector<32x64xf32>
    %14 = math.sqrt %13 : vector<32x64xf32>
    %15 = arith.truncf %14 : vector<32x64xf32> to vector<32x64xbf16>
    %c0_5 = arith.constant 0 : index
    %c0_6 = arith.constant 0 : index
    %16 = vector.load %arg4[%c0_5, %c0_6] : memref<64x256xbf16, #tpu.memory_space<vmem>>, vector<64x256xbf16>
    %cst_7 = arith.constant dense<0.000000e+00> : vector<32x256xf32>
    %17 = tpu.matmul %15, %16, %cst_7 {dimension_numbers = #tpu.dot_dimension_numbers<[1], [0], [0], [1], [0, 0, 1, 1], [], []>} : vector<32x64xbf16>, vector<64x256xbf16>, vector<32x256xf32> -> vector<32x256xf32>
    %c0_8 = arith.constant 0 : index
    %c0_9 = arith.constant 0 : index
    %18 = vector.load %arg5[%c0_8, %c0_9] : memref<256x256xbf16, #tpu.memory_space<vmem>>, vector<256x256xbf16>
    %cst_10 = arith.constant dense<0.000000e+00> : vector<32x256xf32>
    %19 = tpu.matmul %1, %18, %cst_10 {dimension_numbers = #tpu.dot_dimension_numbers<[1], [0], [0], [1], [0, 0, 1, 1], [], []>} : vector<32x256xbf16>, vector<256x256xbf16>, vector<32x256xf32> -> vector<32x256xf32>
    %20 = arith.addf %17, %19 : vector<32x256xf32>
    %21 = arith.truncf %5 : vector<96x64xf32> to vector<96x64xbf16>
    %c0_11 = arith.constant 0 : index
    %c0_12 = arith.constant 0 : index
    %22 = vector.load %arg6[%c0_11, %c0_12] : memref<64x64xbf16, #tpu.memory_space<vmem>>, vector<64x64xbf16>
    %cst_13 = arith.constant dense<0.000000e+00> : vector<96x64xf32>
    %23 = tpu.matmul %21, %22, %cst_13 {dimension_numbers = #tpu.dot_dimension_numbers<[1], [0], [0], [1], [0, 0, 1, 1], [], []>} : vector<96x64xbf16>, vector<64x64xbf16>, vector<96x64xf32> -> vector<96x64xf32>
    %24 = arith.truncf %20 : vector<32x256xf32> to vector<32x256xbf16>
    %c0_14 = arith.constant 0 : index
    %c0_15 = arith.constant 0 : index
    %25 = vector.load %arg7[%c0_14, %c0_15] : memref<256x128xbf16, #tpu.memory_space<vmem>>, vector<256x128xbf16>
    %cst_16 = arith.constant dense<0.000000e+00> : vector<32x128xf32>
    %26 = tpu.matmul %24, %25, %cst_16 {dimension_numbers = #tpu.dot_dimension_numbers<[1], [0], [0], [1], [0, 0, 1, 1], [], []>} : vector<32x256xbf16>, vector<256x128xbf16>, vector<32x128xf32> -> vector<32x128xf32>
    %c0_17 = arith.constant 0 : index
    %c0_18 = arith.constant 0 : index
    %27 = vector.load %arg8[%c0_17, %c0_18] : memref<1x128xf32, #tpu.memory_space<vmem>>, vector<1x128xf32>
    %28 = vector.broadcast %27 : vector<1x128xf32> to vector<32x128xf32>
    %29 = arith.addf %26, %28 : vector<32x128xf32>
    %c0_19 = arith.constant 0 : index
    %c0_20 = arith.constant 0 : index
    %30 = vector.load %arg16[%c0_19, %c0_20] : memref<32x128xf32, #tpu.memory_space<vmem>>, vector<32x128xf32>
    tpu.vector_store %arg16[%c0_19, %c0_20], %29 {strides = array<i32>} : memref<32x128xf32, #tpu.memory_space<vmem>>, vector<32x128xf32>,
    %c0_21 = arith.constant 0 : index
    %c0_22 = arith.constant 0 : index
    %31 = vector.load %arg9[%c0_21, %c0_22] : memref<256x128xbf16, #tpu.memory_space<vmem>>, vector<256x128xbf16>
    %cst_23 = arith.constant dense<0.000000e+00> : vector<32x128xf32>
    %32 = tpu.matmul %24, %31, %cst_23 {dimension_numbers = #tpu.dot_dimension_numbers<[1], [0], [0], [1], [0, 0, 1, 1], [], []>} : vector<32x256xbf16>, vector<256x128xbf16>, vector<32x128xf32> -> vector<32x128xf32>
    %c0_24 = arith.constant 0 : index
    %c0_25 = arith.constant 0 : index
    %33 = vector.load %arg10[%c0_24, %c0_25] : memref<1x128xf32, #tpu.memory_space<vmem>>, vector<1x128xf32>
    %34 = vector.broadcast %33 : vector<1x128xf32> to vector<32x128xf32>
    %35 = arith.addf %32, %34 : vector<32x128xf32>
    %c0_26 = arith.constant 0 : index
    %c0_27 = arith.constant 0 : index
    %36 = vector.load %arg17[%c0_26, %c0_27] : memref<32x128xf32, #tpu.memory_space<vmem>>, vector<32x128xf32>
    tpu.vector_store %arg17[%c0_26, %c0_27], %35 {strides = array<i32>} : memref<32x128xf32, #tpu.memory_space<vmem>>, vector<32x128xf32>,
    %37 = arith.truncf %23 : vector<96x64xf32> to vector<96x64xbf16>
    %c0_28 = arith.constant 0 : index
    %c0_29 = arith.constant 0 : index
    %38 = vector.load %arg11[%c0_28, %c0_29] : memref<64x128xbf16, #tpu.memory_space<vmem>>, vector<64x128xbf16>
    %cst_30 = arith.constant dense<0.000000e+00> : vector<96x128xf32>
    %39 = tpu.matmul %37, %38, %cst_30 {dimension_numbers = #tpu.dot_dimension_numbers<[1], [0], [0], [1], [0, 0, 1, 1], [], []>} : vector<96x64xbf16>, vector<64x128xbf16>, vector<96x128xf32> -> vector<96x128xf32>
    %c0_31 = arith.constant 0 : index
    %c0_32 = arith.constant 0 : index
    %40 = vector.load %arg18[%c0_31, %c0_32] : memref<96x128xf32, #tpu.memory_space<vmem>>, vector<96x128xf32>
    tpu.vector_store %arg18[%c0_31, %c0_32], %39 {strides = array<i32>} : memref<96x128xf32, #tpu.memory_space<vmem>>, vector<96x128xf32>,
    %c0_33 = arith.constant 0 : index
    %c0_34 = arith.constant 0 : index
    %41 = vector.load %arg12[%c0_33, %c0_34] : memref<64x64xbf16, #tpu.memory_space<vmem>>, vector<64x64xbf16>
    %cst_35 = arith.constant dense<0.000000e+00> : vector<96x64xf32>
    %42 = tpu.matmul %3, %41, %cst_35 {dimension_numbers = #tpu.dot_dimension_numbers<[1], [0], [0], [1], [0, 0, 1, 1], [], []>} : vector<96x64xbf16>, vector<64x64xbf16>, vector<96x64xf32> -> vector<96x64xf32>
    %43 = vector.extract_strided_slice %42 {offsets = [0, 0], sizes = [32, 64], strides = [1, 1]} : vector<96x64xf32> to vector<32x64xf32>
    %44 = arith.mulf %43, %43 : vector<32x64xf32>
    %45 = vector.extract_strided_slice %42 {offsets = [32, 0], sizes = [32, 64], strides = [1, 1]} : vector<96x64xf32> to vector<32x64xf32>
    %46 = arith.mulf %45, %45 : vector<32x64xf32>
    %47 = arith.addf %44, %46 : vector<32x64xf32>
    %48 = vector.extract_strided_slice %42 {offsets = [64, 0], sizes = [32, 64], strides = [1, 1]} : vector<96x64xf32> to vector<32x64xf32>
    %49 = arith.mulf %48, %48 : vector<32x64xf32>
    %50 = arith.addf %47, %49 : vector<32x64xf32>
    %51 = math.sqrt %50 : vector<32x64xf32>
    %52 = arith.truncf %51 : vector<32x64xf32> to vector<32x64xbf16>
    %c0_36 = arith.constant 0 : index
    %c0_37 = arith.constant 0 : index
    %53 = vector.load %arg13[%c0_36, %c0_37] : memref<64x256xbf16, #tpu.memory_space<vmem>>, vector<64x256xbf16>
    %cst_38 = arith.constant dense<0.000000e+00> : vector<32x256xf32>
    %54 = tpu.matmul %52, %53, %cst_38 {dimension_numbers = #tpu.dot_dimension_numbers<[1], [0], [0], [1], [0, 0, 1, 1], [], []>} : vector<32x64xbf16>, vector<64x256xbf16>, vector<32x256xf32> -> vector<32x256xf32>
    %c0_39 = arith.constant 0 : index
    %c0_40 = arith.constant 0 : index
    %55 = vector.load %arg14[%c0_39, %c0_40] : memref<256x256xbf16, #tpu.memory_space<vmem>>, vector<256x256xbf16>
    %cst_41 = arith.constant dense<0.000000e+00> : vector<32x256xf32>
    %56 = tpu.matmul %1, %55, %cst_41 {dimension_numbers = #tpu.dot_dimension_numbers<[1], [0], [0], [1], [0, 0, 1, 1], [], []>} : vector<32x256xbf16>, vector<256x256xbf16>, vector<32x256xf32> -> vector<32x256xf32>
    %57 = arith.addf %54, %56 : vector<32x256xf32>
    %58 = arith.truncf %42 : vector<96x64xf32> to vector<96x64xbf16>
    %c0_42 = arith.constant 0 : index
    %c0_43 = arith.constant 0 : index
    %59 = vector.load %arg15[%c0_42, %c0_43] : memref<64x64xbf16, #tpu.memory_space<vmem>>, vector<64x64xbf16>
    %cst_44 = arith.constant dense<0.000000e+00> : vector<96x64xf32>
    %60 = tpu.matmul %58, %59, %cst_44 {dimension_numbers = #tpu.dot_dimension_numbers<[1], [0], [0], [1], [0, 0, 1, 1], [], []>} : vector<96x64xbf16>, vector<64x64xbf16>, vector<96x64xf32> -> vector<96x64xf32>
    %c0_45 = arith.constant 0 : index
    %c0_46 = arith.constant 0 : index
    %61 = vector.load %arg19[%c0_45, %c0_46] : memref<32x256xf32, #tpu.memory_space<vmem>>, vector<32x256xf32>
    tpu.vector_store %arg19[%c0_45, %c0_46], %57 {strides = array<i32>} : memref<32x256xf32, #tpu.memory_space<vmem>>, vector<32x256xf32>,
    %c0_47 = arith.constant 0 : index
    %c0_48 = arith.constant 0 : index
    %62 = vector.load %arg20[%c0_47, %c0_48] : memref<96x64xf32, #tpu.memory_space<vmem>>, vector<96x64xf32>
    tpu.vector_store %arg20[%c0_47, %c0_48], %60 {strides = array<i32>} : memref<96x64xf32, #tpu.memory_space<vmem>>, vector<96x64xf32>,
    return
  }
  func.func @transform_0(%arg0: i32) -> (i32, i32) {
    %c0_i32 = arith.constant 0 : i32
    %c0_i32_0 = arith.constant 0 : i32
    %c0_i32_1 = arith.constant 0 : i32
    return %c0_i32, %c0_i32_0 : i32, i32
  }
  func.func @transform_1(%arg0: i32) -> (i32, i32) {
    %c0_i32 = arith.constant 0 : i32
    %c0_i32_0 = arith.constant 0 : i32
    %c0_i32_1 = arith.constant 0 : i32
    return %c0_i32, %c0_i32_0 : i32, i32
  }
  func.func @transform_2(%arg0: i32) -> (i32, i32) {
    %c0_i32 = arith.constant 0 : i32
    %c0_i32_0 = arith.constant 0 : i32
    %c0_i32_1 = arith.constant 0 : i32
    return %c0_i32, %c0_i32_0 : i32, i32
  }
  func.func @transform_3(%arg0: i32) -> (i32, i32) {
    %c0_i32 = arith.constant 0 : i32
    %c0_i32_0 = arith.constant 0 : i32
    %c0_i32_1 = arith.constant 0 : i32
    return %c0_i32, %c0_i32_0 : i32, i32
  }
  func.func @transform_4(%arg0: i32) -> (i32, i32) {
    %c0_i32 = arith.constant 0 : i32
    %c0_i32_0 = arith.constant 0 : i32
    %c0_i32_1 = arith.constant 0 : i32
    return %c0_i32, %c0_i32_0 : i32, i32
  }
  func.func @transform_5(%arg0: i32) -> (i32, i32) {
    %c0_i32 = arith.constant 0 : i32
    %c0_i32_0 = arith.constant 0 : i32
    %c0_i32_1 = arith.constant 0 : i32
    return %c0_i32, %c0_i32_0 : i32, i32
  }
  func.func @transform_6(%arg0: i32) -> (i32, i32) {
    %c0_i32 = arith.constant 0 : i32
    %c0_i32_0 = arith.constant 0 : i32
    %c0_i32_1 = arith.constant 0 : i32
    return %c0_i32, %c0_i32_0 : i32, i32
  }
  func.func @transform_7(%arg0: i32) -> (i32, i32) {
    %c0_i32 = arith.constant 0 : i32
    %c0_i32_0 = arith.constant 0 : i32
    %c0_i32_1 = arith.constant 0 : i32
    return %c0_i32, %c0_i32_0 : i32, i32
  }
  func.func @transform_8(%arg0: i32) -> (i32, i32) {
    %c0_i32 = arith.constant 0 : i32
    %c0_i32_0 = arith.constant 0 : i32
    %c0_i32_1 = arith.constant 0 : i32
    return %c0_i32, %c0_i32_0 : i32, i32
  }
  func.func @transform_9(%arg0: i32) -> (i32, i32) {
    %c0_i32 = arith.constant 0 : i32
    %c0_i32_0 = arith.constant 0 : i32
    %c0_i32_1 = arith.constant 0 : i32
    return %c0_i32, %c0_i32_0 : i32, i32
  }
  func.func @transform_10(%arg0: i32) -> (i32, i32) {
    %c0_i32 = arith.constant 0 : i32
    %c0_i32_0 = arith.constant 0 : i32
    %c0_i32_1 = arith.constant 0 : i32
    return %c0_i32, %c0_i32_0 : i32, i32
  }
  func.func @transform_11(%arg0: i32) -> (i32, i32) {
    %c0_i32 = arith.constant 0 : i32
    %c0_i32_0 = arith.constant 0 : i32
    %c0_i32_1 = arith.constant 0 : i32
    return %c0_i32, %c0_i32_0 : i32, i32
  }
  func.func @transform_12(%arg0: i32) -> (i32, i32) {
    %c0_i32 = arith.constant 0 : i32
    %c0_i32_0 = arith.constant 0 : i32
    %c0_i32_1 = arith.constant 0 : i32
    return %c0_i32, %c0_i32_0 : i32, i32
  }
  func.func @transform_13(%arg0: i32) -> (i32, i32) {
    %c0_i32 = arith.constant 0 : i32
    %c0_i32_0 = arith.constant 0 : i32
    %c0_i32_1 = arith.constant 0 : i32
    return %c0_i32, %c0_i32_0 : i32, i32
  }
  func.func @transform_14(%arg0: i32) -> (i32, i32) {
    %c0_i32 = arith.constant 0 : i32
    %c0_i32_0 = arith.constant 0 : i32
    %c0_i32_1 = arith.constant 0 : i32
    return %c0_i32, %c0_i32_0 : i32, i32
  }
  func.func @transform_15(%arg0: i32) -> (i32, i32) {
    %c0_i32 = arith.constant 0 : i32
    %c0_i32_0 = arith.constant 0 : i32
    %c0_i32_1 = arith.constant 0 : i32
    return %c0_i32, %c0_i32_0 : i32, i32
  }
  func.func @transform_16(%arg0: i32) -> (i32, i32) {
    %c0_i32 = arith.constant 0 : i32
    %c0_i32_0 = arith.constant 0 : i32
    %c0_i32_1 = arith.constant 0 : i32
    return %c0_i32, %c0_i32_0 : i32, i32
  }
  func.func @transform_17(%arg0: i32) -> (i32, i32) {
    %c0_i32 = arith.constant 0 : i32
    %c0_i32_0 = arith.constant 0 : i32
    %c0_i32_1 = arith.constant 0 : i32
    return %c0_i32, %c0_i32_0 : i32, i32
  }
  func.func @transform_18(%arg0: i32) -> (i32, i32) {
    %c0_i32 = arith.constant 0 : i32
    %c0_i32_0 = arith.constant 0 : i32
    %c0_i32_1 = arith.constant 0 : i32
    return %c0_i32, %c0_i32_0 : i32, i32
  }
  func.func @transform_19(%arg0: i32) -> (i32, i32) {
    %c0_i32 = arith.constant 0 : i32
    %c0_i32_0 = arith.constant 0 : i32
    %c0_i32_1 = arith.constant 0 : i32
    return %c0_i32, %c0_i32_0 : i32, i32
  }
}

</mosaic_0001>

<bundles_post_ra>
// kernel: tpu_custom_call.1
= control target key start
LH: loop header
LB: loop body
LE: loop exit
PB: predicated region body
PF: predicated region fallthrough
CT: control target
= control target key end

     0   :  { %s3760_s0 = inlined_call_operand.hbm [shape: f32[32,256], index: 0, kind: input, shape index: {}]   ;;  %s3761_s1 = inlined_call_operand.vmem [shape: f32[96,64], index: 1, kind: input, shape index: {}]   ;;  %s3762_s2 = inlined_call_operand.hbm [shape: bf16[64,64], index: 2, kind: input, shape index: {}]   ;;  %s3763_s3 = inlined_call_operand.hbm [shape: bf16[64,256], index: 3, kind: input, shape index: {}]   ;;  %s3764_s4 = inlined_call_operand.hbm [shape: bf16[256,256], index: 4, kind: input, shape index: {}]   ;;  %s3765_s5 = inlined_call_operand.hbm [shape: bf16[64,64], index: 5, kind: input, shape index: {}]   ;;  %s3766_s6 = inlined_call_operand.vmem [shape: bf16[256,128], index: 6, kind: input, shape index: {}]   ;;  %s3767_s7 = inlined_call_operand.vmem [shape: f32[1,128], index: 7, kind: input, shape index: {}]   ;;  %s3768_s8 = inlined_call_operand.hbm [shape: bf16[256,128], index: 8, kind: input, shape index: {}]   ;;  %s3769_s9 = inlined_call_operand.vmem [shape: f32[1,128], index: 9, kind: input, shape index: {}]   ;;  %s3770_s10 = inlined_call_operand.hbm [shape: bf16[64,128], index: 10, kind: input, shape index: {}]   ;;  %s3771_s11 = inlined_call_operand.hbm [shape: bf16[64,64], index: 11, kind: input, shape index: {}]   ;;  %s3772_s12 = inlined_call_operand.vmem [shape: bf16[64,256], index: 12, kind: input, shape index: {}]   ;;  %s3773_s13 = inlined_call_operand.hbm [shape: bf16[256,256], index: 13, kind: input, shape index: {}]   ;;  %s3774_s14 = inlined_call_operand.hbm [shape: bf16[64,64], index: 14, kind: input, shape index: {}]   ;;  %s3775_s15 = inlined_call_operand.hbm [shape: f32[32,128], index: 15, kind: output, shape index: {0}]   ;;  %s3776_s16 = inlined_call_operand.hbm [shape: f32[32,128], index: 16, kind: output, shape index: {1}]   ;;  %s3777_s17 = inlined_call_operand.hbm [shape: f32[96,128], index: 17, kind: output, shape index: {2}]   ;;  %s3778_s18 = inlined_call_operand.hbm [shape: f32[32,256], index: 18, kind: output, shape index: {3}]   ;;  %s3779_s19 = inlined_call_operand.vmem [shape: f32[96,64], index: 19, kind: output, shape index: {4}]  }
   0x1   :  { %3790 = sst [smem:[#allocation34_spill]] %s3760_s0 }
   0x2   :  { %3791 = sst [smem:[#allocation35_spill]] %s3761_s1 }
   0x3   :  { %3792 = sst [smem:[#allocation36_spill]] %s3762_s2 }
   0x4   :  { %3793 = sst [smem:[#allocation37_spill]] %s3763_s3 }
   0x5   :  { %3794 = sst [smem:[#allocation38_spill]] %s3778_s18 }
   0x6   :  { %3795 = sst [smem:[#allocation39_spill]] %s3779_s19 }
   0x7   :  { %25 = vsyncpa [#allocation3], 0 }
   0x8   :  { %26 = vsyncpa [#allocation6], 0 }
   0x9   :  { %27 = vsyncpa [#allocation9], 0 }
   0xa   :  { %28 = vsyncpa [#allocation12], 0 }
   0xb   :  { %29 = vsyncpa [#allocation15], 0 }
   0xc   :  { %30 = vsyncpa [#allocation18], 0 }
   0xd   :  { %31 = vsyncpa [#allocation4], 0 }
   0xe   :  { %32 = vsyncpa [#allocation21], 0 }
   0xf   :  { %33 = vsyncpa [#allocation24], 0  ;;  %s3095_s0 = smov [#allocation5]   ;;  %s3796_s1 = sld [smem:[#allocation36_spill]] }
  0x10   :  { %s53_s30 = sshll.u32 %s3095_s0, 4  ;;  %s54_s30 = int_to_ptr.vmem [resolvable:$true] %s53_s30 }
  0x15   :  { %s2769_s22 = scalar_lea.hbm %s3796_s1, 512 }
  0x16   :  { %p2770_p0 = scmp.ne.s32.totalorder %s3796_s1, %s2769_s22  ;;  %p2773_p1 = scmp.lt.u32.totalorder %s2769_s22, %s3796_s1 }
  0x18   :  { %p2775_p2 = pnand %p2773_p1, %p2770_p0 }
  0x1a   :  { %2778 = shalt.err (!%p2775_p2)
}
  0x1b   :  { %s2779_s3 = scalar_lea.vmem %s54_s30, 512  ;;  %p2784_p4 = scmp.lt.s32.totalorder %s54_s30, %s54_s30 }
  0x1c   :  { %p2780_p3 = scmp.ne.s32.totalorder %s54_s30, %s2779_s3  ;;  %p2785_p5 = scmp.lt.s32.totalorder %s2779_s3, %s2779_s3 }
  0x1e   :  { %p2786_p6 = por %p2785_p5, %p2784_p4 }
  0x20   :  { %p2787_p7 = pnand %p2786_p6, %p2780_p3 }
  0x22   :  { %2790 = shalt.err (!%p2787_p7)
}
  0x23   :  { %s3786_s26 = smov 64   ;;  %s3788_s27 = smov 4  }
  0x24   :  { %59 = dma.hbm_to_vmem [thread:$0]  %s3796_s1, 512, %s54_s30, [#allocation6], %s3786_s26, %s3786_s26, %s3788_s27  }
  0x25   :  { %s3098_s0 = smov [#allocation8]   ;;  %s3099_s21 = smov [#allocation11]  }
  0x26   :  { %s77_s20 = sshll.u32 %s3098_s0, 4  ;;  %s105_s22 = sshll.u32 %s3099_s21, 4  ;;  %s78_s20 = int_to_ptr.vmem [resolvable:$true] %s77_s20  ;;  %s106_s22 = int_to_ptr.vmem [resolvable:$true] %s105_s22 }
  0x27   :  { %s2791_s24 = scalar_lea.hbm %s3764_s4, 4096 }
  0x28   :  { %p2792_p8 = scmp.ne.s32.totalorder %s3764_s4, %s2791_s24  ;;  %p2795_p9 = scmp.lt.u32.totalorder %s2791_s24, %s3764_s4 }
  0x2a   :  { %p2797_p10 = pnand %p2795_p9, %p2792_p8 }
  0x2c   :  { %2800 = shalt.err (!%p2797_p10)
}
  0x2d   :  { %s2801_s30 = scalar_lea.vmem %s78_s20, 4096  ;;  %p2806_p12 = scmp.lt.s32.totalorder %s78_s20, %s78_s20 }
  0x2e   :  { %p2802_p11 = scmp.ne.s32.totalorder %s78_s20, %s2801_s30  ;;  %p2807_p13 = scmp.lt.s32.totalorder %s2801_s30, %s2801_s30 }
  0x30   :  { %p2808_p0 = por %p2807_p13, %p2806_p12 }
  0x32   :  { %p2809_p1 = pnand %p2808_p0, %p2802_p11 }
  0x34   :  { %2812 = shalt.err (!%p2809_p1)
}
  0x35   :  { %s3100_s1 = smov 128   ;;  %s3101_s28 = smov 8  }
  0x36   :  { %83 = dma.hbm_to_vmem [thread:$0]  %s3764_s4, 4096, %s78_s20, [#allocation9], %s3100_s1, %s3100_s1, %s3101_s28  }
  0x37   :  { %s2813_s21 = scalar_lea.hbm %s3768_s8, 2048 }
  0x38   :  { %p2814_p2 = scmp.ne.s32.totalorder %s3768_s8, %s2813_s21  ;;  %p2817_p3 = scmp.lt.u32.totalorder %s2813_s21, %s3768_s8 }
  0x3a   :  { %p2819_p4 = pnand %p2817_p3, %p2814_p2 }
  0x3c   :  { %2822 = shalt.err (!%p2819_p4)
}
  0x3d   :  { %s2823_s3 = scalar_lea.vmem %s106_s22, 2048  ;;  %p2828_p6 = scmp.lt.s32.totalorder %s106_s22, %s106_s22 }
  0x3e   :  { %p2824_p5 = scmp.ne.s32.totalorder %s106_s22, %s2823_s3  ;;  %p2829_p7 = scmp.lt.s32.totalorder %s2823_s3, %s2823_s3 }
  0x40   :  { %p2830_p8 = por %p2829_p7, %p2828_p6 }
  0x42   :  { %p2831_p9 = pnand %p2830_p8, %p2824_p5 }
  0x44   :  { %2834 = shalt.err (!%p2831_p9)
}
  0x45   :  { %111 = dma.hbm_to_vmem [thread:$0]  %s3768_s8, 2048, %s106_s22, [#allocation12], %s3786_s26, %s3786_s26, %s3788_s27  }
  0x46   :  { %s3102_s30 = smov [#allocation14]   ;;  %s3103_s0 = smov [#allocation2]  }
  0x47   :  { %s131_s29 = sshll.u32 %s3102_s30, 4  ;;  %s39_s18 = sshll.u32 %s3103_s0, 4  ;;  %s132_s29 = int_to_ptr.vmem [resolvable:$true] %s131_s29  ;;  %s40_s18 = int_to_ptr.vmem [resolvable:$true] %s39_s18 }
  0x48   :  { %s2835_s2 = scalar_lea.hbm %s3771_s11, 512 }
  0x49   :  { %p2836_p10 = scmp.ne.s32.totalorder %s3771_s11, %s2835_s2  ;;  %p2839_p11 = scmp.lt.u32.totalorder %s2835_s2, %s3771_s11 }
  0x4b   :  { %p2841_p12 = pnand %p2839_p11, %p2836_p10 }
  0x4d   :  { %2844 = shalt.err (!%p2841_p12)
}
  0x4e   :  { %s2845_s8 = scalar_lea.vmem %s132_s29, 512  ;;  %p2850_p0 = scmp.lt.s32.totalorder %s132_s29, %s132_s29 }
  0x4f   :  { %p2846_p13 = scmp.ne.s32.totalorder %s132_s29, %s2845_s8  ;;  %p2851_p1 = scmp.lt.s32.totalorder %s2845_s8, %s2845_s8 }
  0x51   :  { %p2852_p2 = por %p2851_p1, %p2850_p0 }
  0x53   :  { %p2853_p3 = pnand %p2852_p2, %p2846_p13 }
  0x55   :  { %2856 = shalt.err (!%p2853_p3)
}
  0x56   :  { %137 = dma.hbm_to_vmem [thread:$0]  %s3771_s11, 512, %s132_s29, [#allocation15], %s3786_s26, %s3786_s26, %s3788_s27  }
  0x57   :  { %s3797_s0 = sld [smem:[#allocation34_spill]] }
  0x5d   :  { %s2857_s19 = scalar_lea.hbm %s3797_s0, 1024 }
  0x5e   :  { %p2858_p4 = scmp.ne.s32.totalorder %s3797_s0, %s2857_s19  ;;  %p2861_p5 = scmp.lt.u32.totalorder %s2857_s19, %s3797_s0 }
  0x60   :  { %p2863_p6 = pnand %p2861_p5, %p2858_p4 }
  0x62   :  { %2866 = shalt.err (!%p2863_p6)
}
  0x63   :  { %s2867_s25 = scalar_lea.vmem %s40_s18, 1024  ;;  %p2872_p8 = scmp.lt.s32.totalorder %s40_s18, %s40_s18 }
  0x64   :  { %p2868_p7 = scmp.ne.s32.totalorder %s40_s18, %s2867_s25  ;;  %p2873_p9 = scmp.lt.s32.totalorder %s2867_s25, %s2867_s25 }
  0x66   :  { %p2874_p10 = por %p2873_p9, %p2872_p8 }
  0x68   :  { %p2875_p11 = pnand %p2874_p10, %p2868_p7 }
  0x6a   :  { %2878 = shalt.err (!%p2875_p11)
}
  0x6b   :  { %s3104_s11 = smov 256   ;;  %s3105_s29 = smov 16  }
  0x6c   :  { %45 = dma.hbm_to_vmem [thread:$0]  %s3797_s0, 1024, %s40_s18, [#allocation3], %s3104_s11, %s3104_s11, %s3105_s29  }
  0x6d   :  { %s3106_s22 = smov [#allocation7]   ;;  %s3107_s20 = smov [#allocation10]  }
  0x6e   :  { %s65_s4 = sshll.u32 %s3106_s22, 4  ;;  %s89_s30 = sshll.u32 %s3107_s20, 4  ;;  %s66_s4 = int_to_ptr.vmem [resolvable:$true] %s65_s4  ;;  %s90_s30 = int_to_ptr.vmem [resolvable:$true] %s89_s30 }
  0x6f   :  { %s3798_s2 = sld [smem:[#allocation37_spill]] }
  0x75   :  { %s2879_s23 = scalar_lea.hbm %s3798_s2, 1024 }
  0x76   :  { %p2880_p12 = scmp.ne.s32.totalorder %s3798_s2, %s2879_s23  ;;  %p2883_p13 = scmp.lt.u32.totalorder %s2879_s23, %s3798_s2 }
  0x78   :  { %p2885_p0 = pnand %p2883_p13, %p2880_p12 }
  0x7a   :  { %2888 = shalt.err (!%p2885_p0)
}
  0x7b   :  { %s2889_s18 = scalar_lea.vmem %s66_s4, 1024  ;;  %p2894_p2 = scmp.lt.s32.totalorder %s66_s4, %s66_s4 }
  0x7c   :  { %p2890_p1 = scmp.ne.s32.totalorder %s66_s4, %s2889_s18  ;;  %p2895_p3 = scmp.lt.s32.totalorder %s2889_s18, %s2889_s18 }
  0x7e   :  { %p2896_p4 = por %p2895_p3, %p2894_p2 }
  0x80   :  { %p2897_p5 = pnand %p2896_p4, %p2890_p1 }
  0x82   :  { %2900 = shalt.err (!%p2897_p5)
}
  0x83   :  { %71 = dma.hbm_to_vmem [thread:$0]  %s3798_s2, 1024, %s66_s4, [#allocation6], %s3100_s1, %s3100_s1, %s3101_s28  }
  0x84   :  { %s2901_s27 = scalar_lea.hbm %s3765_s5, 512 }
  0x85   :  { %p2902_p6 = scmp.ne.s32.totalorder %s3765_s5, %s2901_s27  ;;  %p2905_p7 = scmp.lt.u32.totalorder %s2901_s27, %s3765_s5 }
  0x87   :  { %p2907_p8 = pnand %p2905_p7, %p2902_p6 }
  0x89   :  { %2910 = shalt.err (!%p2907_p8)
}
  0x8a   :  { %s2911_s23 = scalar_lea.vmem %s90_s30, 512  ;;  %p2916_p10 = scmp.lt.s32.totalorder %s90_s30, %s90_s30 }
  0x8b   :  { %p2912_p9 = scmp.ne.s32.totalorder %s90_s30, %s2911_s23  ;;  %p2917_p11 = scmp.lt.s32.totalorder %s2911_s23, %s2911_s23 }
  0x8d   :  { %p2918_p12 = por %p2917_p11, %p2916_p10 }
  0x8f   :  { %p2919_p13 = pnand %p2918_p12, %p2912_p9 }
  0x91   :  { %2922 = shalt.err (!%p2919_p13)
}
  0x92   :  { %s3799_s4 = smov 4   ;;  %s3800_s2 = smov 64  }
  0x93   :  { %95 = dma.hbm_to_vmem [thread:$0]  %s3765_s5, 512, %s90_s30, [#allocation9], %s3800_s2, %s3800_s2, %s3799_s4  }
  0x94   :  { %s3108_s18 = smov [#allocation13]   ;;  %s3109_s3 = smov [#allocation16]  }
  0x95   :  { %s119_s0 = sshll.u32 %s3108_s18, 4  ;;  %s145_s8 = sshll.u32 %s3109_s3, 4  ;;  %s120_s0 = int_to_ptr.vmem [resolvable:$true] %s119_s0  ;;  %s146_s8 = int_to_ptr.vmem [resolvable:$true] %s145_s8 }
  0x96   :  { %s2923_s22 = scalar_lea.hbm %s3770_s10, 512 }
  0x97   :  { %p2924_p0 = scmp.ne.s32.totalorder %s3770_s10, %s2923_s22  ;;  %p2927_p1 = scmp.lt.u32.totalorder %s2923_s22, %s3770_s10 }
  0x99   :  { %p2929_p2 = pnand %p2927_p1, %p2924_p0 }
  0x9b   :  { %2932 = shalt.err (!%p2929_p2)
}
  0x9c   :  { %s2933_s5 = scalar_lea.vmem %s120_s0, 512  ;;  %p2938_p4 = scmp.lt.s32.totalorder %s120_s0, %s120_s0 }
  0x9d   :  { %p2934_p3 = scmp.ne.s32.totalorder %s120_s0, %s2933_s5  ;;  %p2939_p5 = scmp.lt.s32.totalorder %s2933_s5, %s2933_s5 }
  0x9f   :  { %p2940_p6 = por %p2939_p5, %p2938_p4 }
  0xa1   :  { %p2941_p7 = pnand %p2940_p6, %p2934_p3 }
  0xa3   :  { %2944 = shalt.err (!%p2941_p7)
}
  0xa4   :  { %125 = dma.hbm_to_vmem [thread:$0]  %s3770_s10, 512, %s120_s0, [#allocation12], %s3800_s2, %s3800_s2, %s3799_s4  }
  0xa5   :  { %s2945_s3 = scalar_lea.hbm %s3773_s13, 4096 }
  0xa6   :  { %p2946_p8 = scmp.ne.s32.totalorder %s3773_s13, %s2945_s3  ;;  %p2949_p9 = scmp.lt.u32.totalorder %s2945_s3, %s3773_s13 }
  0xa8   :  { %p2951_p10 = pnand %p2949_p9, %p2946_p8 }
  0xaa   :  { %2954 = shalt.err (!%p2951_p10)
}
  0xab   :  { %s2955_s19 = scalar_lea.vmem %s146_s8, 4096  ;;  %p2960_p12 = scmp.lt.s32.totalorder %s146_s8, %s146_s8 }
  0xac   :  { %p2956_p11 = scmp.ne.s32.totalorder %s146_s8, %s2955_s19  ;;  %p2961_p13 = scmp.lt.s32.totalorder %s2955_s19, %s2955_s19 }
  0xae   :  { %p2962_p0 = por %p2961_p13, %p2960_p12 }
  0xb0   :  { %p2963_p1 = pnand %p2962_p0, %p2956_p11 }
  0xb2   :  { %2966 = shalt.err (!%p2963_p1)
}
  0xb3   :  { %151 = dma.hbm_to_vmem [thread:$0]  %s3773_s13, 4096, %s146_s8, [#allocation15], %s3100_s1, %s3100_s1, %s3101_s28  }
  0xb4   :  { %s3110_s21 = smov [#allocation17]   ;;  %s2967_s24 = scalar_lea.hbm %s3774_s14, 512 }
  0xb5   :  { %s157_s23 = sshll.u32 %s3110_s21, 4  ;;  %p2968_p2 = scmp.ne.s32.totalorder %s3774_s14, %s2967_s24  ;;  %s158_s23 = int_to_ptr.vmem [resolvable:$true] %s157_s23 }
  0xb6   :  { %p2971_p3 = scmp.lt.u32.totalorder %s2967_s24, %s3774_s14 }
  0xb8   :  { %p2973_p4 = pnand %p2971_p3, %p2968_p2 }
  0xba   :  { %2976 = shalt.err (!%p2973_p4)
}
  0xbb   :  { %s2977_s27 = scalar_lea.vmem %s158_s23, 512  ;;  %p2982_p6 = scmp.lt.s32.totalorder %s158_s23, %s158_s23 }
  0xbc   :  { %p2978_p5 = scmp.ne.s32.totalorder %s158_s23, %s2977_s27  ;;  %p2983_p7 = scmp.lt.s32.totalorder %s2977_s27, %s2977_s27 }
  0xbe   :  { %p2984_p8 = por %p2983_p7, %p2982_p6 }
  0xc0   :  { %p2985_p9 = pnand %p2984_p8, %p2978_p5 }
  0xc2   :  { %2988 = shalt.err (!%p2985_p9)
}
  0xc3   :  { %163 = dma.hbm_to_vmem [thread:$0]  %s3774_s14, 512, %s158_s23, [#allocation18], %s3800_s2, %s3800_s2, %s3799_s4  }
  0xc4   :  { %3077 = dma.done.wait [#allocation3], 1024  }
  0xc5   :  { %3078 = vsyncadd [#allocation3], 4294966272 }
  0xc6   :  { %3079 = dma.done.wait [#allocation6], 1536  }
  0xc7   :  { %3080 = vsyncadd [#allocation6], 4294965760 }
  0xc8   :  { %3081 = dma.done.wait [#allocation9], 4608  }
  0xc9   :  { %3082 = vsyncadd [#allocation9], 4294962688 }
  0xca   :  { %3083 = dma.done.wait [#allocation12], 2560  }
  0xcb   :  { %3084 = vsyncadd [#allocation12], 4294964736 }
  0xcc   :  { %3085 = dma.done.wait [#allocation15], 4608  }
  0xcd   :  { %3086 = vsyncadd [#allocation15], 4294962688 }
  0xce   :  { %3087 = dma.done.wait [#allocation18], 512  }
  0xcf   :  { %3088 = vsyncadd [#allocation18], 4294966784  ;;  %v2581_v0 = vld [vmem:[#allocation5] sm:$0xff]   ;;  %v2582_v1 = vld [vmem:[#allocation5 + $0x8] sm:$0xff]   ;;  %s3801_s4 = sld [smem:[#allocation35_spill]]  ;;  %vm257_vm0 = vcmask 523264  }
  0xd0   :  { %2444 = vmatprep.subr.bf16.mxu0 %v2581_v0  ;;  %v2583_v2 = vld [vmem:[#allocation5 + $0x10] sm:$0xff]   ;;  %v2584_v6 = vld [vmem:[#allocation5 + $0x18] sm:$0xff]   ;;  %v2585_v7 = vld [vmem:[#allocation8 + $0x4] ss:$8 sps:$4 sm:$0xff]   ;;  %s3113_s3 = smov [#allocation19]  }
  0xd1   :  { %2445 = vmatpush3.bf16.msra.mxu0 %v2581_v0  ;;  %v2587_v10 = vld [vmem:[#allocation8] ss:$8 sps:$4 sm:$0xff]   ;;  %607 = vmatprep.subr.bf16.mxu1 %v2585_v7  ;;  %v2588_v12 = vld [vmem:[#allocation8 + $0x14] ss:$8 sps:$4 sm:$0xff]   ;;  %v2590_v14 = vld [vmem:[#allocation8 + $0x10] ss:$8 sps:$4 sm:$0xff]  }
  0xd2   :  { %2446 = vmatprep.subr.bf16.mxu0 %v2582_v1  ;;  %608 = vmatpush1.bf16.msra.mxu1 %v2587_v10  ;;  %v2591_v15 = vld [vmem:[#allocation8 + $0x24] ss:$8 sps:$4 sm:$0xff]   ;;  %v2593_v18 = vld [vmem:[#allocation8 + $0x20] ss:$8 sps:$4 sm:$0xff]   ;;  %v2594_v19 = vld [vmem:[#allocation8 + $0x34] ss:$8 sps:$4 sm:$0xff]  }
  0xd3   :  { %609 = vmatprep.subr.bf16.mxu1 %v2588_v12  ;;  %v2596_v22 = vld [vmem:[#allocation8 + $0x30] ss:$8 sps:$4 sm:$0xff]   ;;  %v2597_v25 = vld [vmem:[#allocation8 + $0x44] ss:$8 sps:$4 sm:$0xff]   ;;  %v2599_v26 = vld [vmem:[#allocation8 + $0x40] ss:$8 sps:$4 sm:$0xff]  }
  0xd4   :  { %v2600_v28 = vld [vmem:[#allocation8 + $0x54] ss:$8 sps:$4 sm:$0xff]   ;;  %v2602_v32 = vld [vmem:[#allocation8 + $0x50] ss:$8 sps:$4 sm:$0xff]   ;;  %v2603_v33 = vld [vmem:[#allocation8 + $0x64] ss:$8 sps:$4 sm:$0xff]  }
  0xd5   :  { %v207_v3 = vld [vmem:[%s3801_s4] sm:$0xff]  ;;  %v208_v4 = vld [vmem:[%s3801_s4 + $0x8] sm:$0xff]  ;;  %2447 = vmatpush3.bf16.msra.mxu0 %v2582_v1  ;;  %v209_v8 = vld [vmem:[%s3801_s4 + $0x10] sm:$0xff]  ;;  %s2102_s26 = sshll.u32 %s3113_s3, 4  ;;  %s2103_s26 = int_to_ptr.vmem [resolvable:$true] %s2102_s26 }
  0xd6   :  { %v3372_v5 = vpack.c.bf16 %v208_v4, %v207_v3  ;;  %2448 = vmatprep.subr.bf16.mxu0 %v2583_v2  ;;  %v210_v9 = vld [vmem:[%s3801_s4 + $0x18] sm:$0xff]  ;;  %v211_v11 = vld [vmem:[%s3801_s4 + $0x20] sm:$0xff]  ;;  %v212_v13 = vld [vmem:[%s3801_s4 + $0x28] sm:$0xff]  ;;  %610 = vmatpush1.bf16.msra.mxu1 %v2590_v14  ;;  %v3111_v3 = vmov 0  }
  0xd7   :  { %v3388_v16 = vpack.c.bf16 %v210_v9, %v209_v8  ;;  %v3390_v17 = vpack.c.bf16 %v212_v13, %v211_v11  ;;  %611 = vmatprep.subr.bf16.mxu1 %v2591_v15  ;;  %v213_v20 = vld [vmem:[%s3801_s4 + $0x30] sm:$0xff]  ;;  %v214_v21 = vld [vmem:[%s3801_s4 + $0x38] sm:$0xff]  ;;  %v215_v23 = vld [vmem:[%s3801_s4 + $0x40] sm:$0xff] }
  0xd8   :  { %2452 = vmatprep.mubr.msk.bf16.mxu0 %vm257_vm0, %v3372_v5  ;;  %v216_v24 = vld [vmem:[%s3801_s4 + $0x48] sm:$0xff]  ;;  %v3408_v27 = vpack.c.bf16 %v214_v21, %v213_v20  ;;  %v217_v30 = vld [vmem:[%s3801_s4 + $0x50] sm:$0xff]  ;;  %v218_v31 = vld [vmem:[%s3801_s4 + $0x58] sm:$0xff] }
  0xd9   :  { %2449 = vmatpush3.bf16.msra.mxu0 %v2583_v2  ;;  %v3410_v29 = vpack.c.bf16 %v216_v24, %v215_v23  ;;  %v2605_v34 = vld [vmem:[#allocation8 + $0x60] ss:$8 sps:$4 sm:$0xff]   ;;  %v3422_v35 = vpack.c.bf16 %v218_v31, %v217_v30  ;;  %v2606_v36 = vld [vmem:[#allocation8 + $0x74] ss:$8 sps:$4 sm:$0xff]   ;;  %v2608_v37 = vld [vmem:[#allocation8 + $0x70] ss:$8 sps:$4 sm:$0xff]  }
  0xda   :  { %2450 = vmatprep.subr.bf16.mxu0 %v2584_v6  ;;  %612 = vmatpush1.bf16.msra.mxu1 %v2593_v18  ;;  %v2609_v38 = vld [vmem:[#allocation8 + $0x84] ss:$8 sps:$4 sm:$0xff]   ;;  %v2611_v39 = vld [vmem:[#allocation8 + $0x80] ss:$8 sps:$4 sm:$0xff]   ;;  %v2612_v40 = vld [vmem:[#allocation8 + $0x94] ss:$8 sps:$4 sm:$0xff]  }
  0xdb   :  { %613 = vmatprep.subr.bf16.mxu1 %v2594_v19  ;;  %v2614_v41 = vld [vmem:[#allocation8 + $0x90] ss:$8 sps:$4 sm:$0xff]   ;;  %v2615_v42 = vld [vmem:[#allocation8 + $0xa4] ss:$8 sps:$4 sm:$0xff]   ;;  %v2617_v43 = vld [vmem:[#allocation8 + $0xa0] ss:$8 sps:$4 sm:$0xff]  }
  0xdc   :  { %v2621_v44 = vld [vmem:[#allocation8 + $0xb4] ss:$8 sps:$4 sm:$0xff]   ;;  %v2623_v45 = vld [vmem:[#allocation8 + $0xb0] ss:$8 sps:$4 sm:$0xff]   ;;  %v2624_v46 = vld [vmem:[#allocation8 + $0xc4] ss:$8 sps:$4 sm:$0xff]  }
  0xdd   :  { %2451 = vmatpush3.bf16.msra.mxu0 %v2584_v6  ;;  %v2626_v47 = vld [vmem:[#allocation8 + $0xc0] ss:$8 sps:$4 sm:$0xff]   ;;  %v2620_v48 = vld [vmem:[#allocation7 + $0x4] ss:$8 sps:$4 sm:$0xff]   ;;  %v2630_v50 = vld [vmem:[#allocation8 + $0xd4] ss:$8 sps:$4 sm:$0xff]  }
  0xde   :  { %614 = vmatpush1.bf16.msra.mxu1 %v2596_v22  ;;  %v2618_v49 = vld [vmem:[#allocation7] ss:$8 sps:$4 sm:$0xff]   ;;  %706 = vmatprep.subr.bf16.mxu0 %v2620_v48  ;;  %v2632_v51 = vld [vmem:[#allocation8 + $0xd0] ss:$8 sps:$4 sm:$0xff]   ;;  %v2629_v52 = vld [vmem:[#allocation7 + $0x14] ss:$8 sps:$4 sm:$0xff]  }
  0xdf   :  { %615 = vmatprep.subr.bf16.mxu1 %v2597_v25  ;;  %v2627_v53 = vld [vmem:[#allocation7 + $0x10] ss:$8 sps:$4 sm:$0xff]   ;;  %v2636_v54 = vld [vmem:[#allocation8 + $0xe4] ss:$8 sps:$4 sm:$0xff]   ;;  %v2638_v55 = vld [vmem:[#allocation8 + $0xe0] ss:$8 sps:$4 sm:$0xff]  }
  0xe0   :  { %2453 = vmatmul.mubr.msk.bf16.vlgmr.msra.gmra.mrb[0].mxu0 %vm257_vm0, %v3388_v16  ;;  %v2635_v56 = vld [vmem:[#allocation7 + $0x24] ss:$8 sps:$4 sm:$0xff]   ;;  %v2633_v57 = vld [vmem:[#allocation7 + $0x20] ss:$8 sps:$4 sm:$0xff]   ;;  %v2639_v58 = vld [vmem:[#allocation8 + $0xf4] ss:$8 sps:$4 sm:$0xff]  }
  0xe1   :  { %2456 = vmatprep.mubr.msk.bf16.mxu0 %vm257_vm0, %v3390_v17  ;;  %707 = vmatpush1.bf16.msra.mxu0 %v2618_v49  ;;  %v2641_v59 = vld [vmem:[#allocation8 + $0xf0] ss:$8 sps:$4 sm:$0xff]   ;;  %v196_v60 = vld [vmem:[#allocation2 + $0x8] sm:$0xff]  ;;  %v2644_v63 = vld [vmem:[#allocation7 + $0x34] ss:$8 sps:$4 sm:$0xff]  }
  0xe2   :  { %616 = vmatpush1.bf16.msra.mxu1 %v2599_v26  ;;  %708 = vmatprep.subr.bf16.mxu0 %v2629_v52  ;;  %v198_v61 = vld [vmem:[#allocation2 + $0x18] sm:$0xff]  ;;  %v195_v1 = vld [vmem:[#allocation2] sm:$0xff]  ;;  %v197_v2 = vld [vmem:[#allocation2 + $0x10] sm:$0xff] }
  0xe3   :  { %617 = vmatprep.subr.bf16.mxu1 %v2600_v28  ;;  %v2642_v62 = vld [vmem:[#allocation7 + $0x30] ss:$8 sps:$4 sm:$0xff]   ;;  %v3426_v0 = vpack.c.bf16 %v198_v61, %v196_v60  ;;  %v3430_v4 = vpack.c.bf16 %v197_v2, %v195_v1  ;;  %v3433_v6 = vld [vmem:[#allocation10] sm:$0xff]   ;;  %v200_v7 = vld [vmem:[#allocation2 + $0x28] sm:$0xff] }
  0xe4   :  { %v202_v8 = vld [vmem:[#allocation2 + $0x38] sm:$0xff]  ;;  %v199_v9 = vld [vmem:[#allocation2 + $0x20] sm:$0xff]  ;;  %v201_v11 = vld [vmem:[#allocation2 + $0x30] sm:$0xff] }
  0xe5   :  { %709 = vmatpush1.bf16.msra.mxu0 %v2627_v53  ;;  %639 = vmatprep.mubr.bf16.mxu1 %v3426_v0  ;;  %v3436_v10 = vpack.c.bf16 %v202_v8, %v200_v7  ;;  %v3438_v12 = vpack.c.bf16 %v201_v11, %v199_v9 }
  0xe6   :  { %618 = vmatpush1.bf16.msra.mxu1 %v2602_v32  ;;  %710 = vmatprep.subr.bf16.mxu0 %v2635_v56 }
  0xe7   :  { %619 = vmatprep.subr.bf16.mxu1 %v2603_v33 }
  0xe8   :  { %2457 = vmatmul.mubr.msk.bf16.gmra.mrb[4].mxu0 %vm257_vm0, %v3408_v27 }
  0xe9   :  { %2460 = vmatprep.mubr.msk.bf16.mxu0 %vm257_vm0, %v3410_v29  ;;  %711 = vmatpush1.bf16.msra.mxu0 %v2633_v57 }
  0xea   :  { %620 = vmatpush1.bf16.msra.mxu1 %v2605_v34  ;;  %712 = vmatprep.subr.bf16.mxu0 %v2644_v63 }
  0xeb   :  { %621 = vmatprep.subr.bf16.mxu1 %v2606_v36 }
  0xed   :  { %713 = vmatpush1.bf16.msra.mxu0 %v2642_v62 }
  0xee   :  { %622 = vmatpush1.bf16.msra.mxu1 %v2608_v37  ;;  %2464 = vmatprep.subr.bf16.mxu0 %v3433_v6 }
  0xef   :  { %623 = vmatprep.subr.bf16.mxu1 %v2609_v38 }
  0xf0   :  { %2461 = vmatmul.mubr.msk.bf16.gmra.mrb[8].mxu0 %vm257_vm0, %v3422_v35 }
  0xf1   :  { %738 = vmatprep.mubr.bf16.mxu0 %v3111_v3 }
  0xf2   :  { %624 = vmatpush1.bf16.msra.mxu1 %v2611_v39 }
  0xf3   :  { %625 = vmatprep.subr.bf16.mxu1 %v2612_v40 }
  0xf6   :  { %626 = vmatpush1.bf16.msra.mxu1 %v2614_v41 }
  0xf7   :  { %627 = vmatprep.subr.bf16.mxu1 %v2615_v42 }
  0xfa   :  { %628 = vmatpush1.bf16.msra.mxu1 %v2617_v43 }
  0xfb   :  { %629 = vmatprep.subr.bf16.mxu1 %v2621_v44 }
  0xfe   :  { %630 = vmatpush1.bf16.msra.mxu1 %v2623_v45 }
  0xff   :  { %631 = vmatprep.subr.bf16.mxu1 %v2624_v46 }
 0x102   :  { %632 = vmatpush1.bf16.msra.mxu1 %v2626_v47 }
 0x103   :  { %633 = vmatprep.subr.bf16.mxu1 %v2630_v50 }
 0x106   :  { %634 = vmatpush1.bf16.msra.mxu1 %v2632_v51 }
 0x107   :  { %635 = vmatprep.subr.bf16.mxu1 %v2636_v54 }
 0x10a   :  { %636 = vmatpush1.bf16.msra.mxu1 %v2638_v55 }
 0x10b   :  { %637 = vmatprep.subr.bf16.mxu1 %v2639_v58 }
 0x10e   :  { %638 = vmatpush1.bf16.msra.mxu1 %v2641_v59 }
 0x111   :  { %640 = vmatmul.mubr.bf16.vlgmr.msra.gmra.mrb[0].mxu1 %v3430_v4 }
 0x112   :  { %649 = vmatprep.mubr.bf16.mxu1 %v3436_v10 }
 0x119   :  { %650 = vmatmul.mubr.bf16.gmra.mrb[4].mxu1 %v3438_v12 }
 0x1b3   :  { %v3442_v13 = vpop.f32.mrb[0].mxu0 }
 0x1b4   :  { %v3444_v14 = vpop.f32.mrb[1].mxu0  ;;  %v359_v22 = vmul.f32 %v3442_v13, %v3442_v13 }
 0x1b5   :  { %v3446_v15 = vpop.f32.mrb[2].mxu0  ;;  %v357_v25 = vmul.f32 %v3444_v14, %v3444_v14 }
 0x1b6   :  { %v760_v18 = vpack.c.bf16 %v3446_v15, %v3442_v13  ;;  %v3450_v19 = vpop.f32.mrb[3].mxu0  ;;  %v360_v30 = vmul.f32 %v3446_v15, %v3446_v15  ;;  %v2654_v13 = vld [vmem:[%s3766_s6 + $0x10] sm:$0xff]   ;;  %v2655_v15 = vld [vmem:[%s3766_s6 + $0x58] sm:$0xff]  }
 0x1b7   :  { %v759_v20 = vpack.c.bf16 %v3450_v19, %v3444_v14  ;;  %v358_v36 = vmul.f32 %v3450_v19, %v3450_v19  ;;  %v2652_v14 = vld [vmem:[%s3766_s6 + $0x8] sm:$0xff]   ;;  %v2653_v19 = vld [vmem:[%s3766_s6 + $0x50] sm:$0xff]  }
 0x1bb   :  { %v3454_v21 = vpop.f32.mrb[4].mxu0 }
 0x1bc   :  { %v363_v23 = vmul.f32 %v3454_v21, %v3454_v21  ;;  %v3460_v24 = vpop.f32.mrb[5].mxu0 }
 0x1bd   :  { %v361_v26 = vmul.f32 %v3460_v24, %v3460_v24  ;;  %v3466_v28 = vpop.f32.mrb[6].mxu0 }
 0x1be   :  { %v367_v31 = vadd.f32 %v363_v23, %v359_v22  ;;  %v364_v32 = vmul.f32 %v3466_v28, %v3466_v28  ;;  %v762_v33 = vpack.c.bf16 %v3466_v28, %v3454_v21  ;;  %v3474_v34 = vpop.f32.mrb[7].mxu0  ;;  %v2658_v21 = vld [vmem:[%s3766_s6 + $0x20] sm:$0xff]   ;;  %v2660_v28 = vld [vmem:[%s3766_s6 + $0x28] sm:$0xff]  }
 0x1bf   :  { %v365_v37 = vadd.f32 %v361_v26, %v357_v25  ;;  %v362_v38 = vmul.f32 %v3474_v34, %v3474_v34  ;;  %v761_v39 = vpack.c.bf16 %v3474_v34, %v3460_v24  ;;  %v2659_v24 = vld [vmem:[%s3766_s6 + $0x68] sm:$0xff]  }
 0x1c0   :  { %v368_v40 = vadd.f32 %v364_v32, %v360_v30 }
 0x1c1   :  { %v366_v41 = vadd.f32 %v362_v38, %v358_v36  ;;  %v2647_v38 = vld [vmem:[#allocation10 + $0x10] sm:$0xff]  }
 0x1c3   :  { %v3482_v42 = vpop.f32.mrb[8].mxu0 }
 0x1c4   :  { %v371_v43 = vmul.f32 %v3482_v42, %v3482_v42  ;;  %v3486_v44 = vpop.f32.mrb[9].mxu0 }
 0x1c5   :  { %v369_v45 = vmul.f32 %v3486_v44, %v3486_v44  ;;  %v3490_v46 = vpop.f32.mrb[10].mxu0 }
 0x1c6   :  { %v375_v47 = vadd.f32 %v371_v43, %v367_v31  ;;  %v372_v48 = vmul.f32 %v3490_v46, %v3490_v46  ;;  %v764_v49 = vpack.c.bf16 %v3490_v46, %v3482_v42  ;;  %v3496_v50 = vpop.f32.mrb[11].mxu0  ;;  %v2651_v43 = vld [vmem:[%s3766_s6 + $0x48] sm:$0xff]   ;;  %v2662_v42 = vld [vmem:[%s3766_s6 + $0x30] sm:$0xff]   ;;  %v2663_v46 = vld [vmem:[%s3766_s6 + $0x78] sm:$0xff]  }
 0x1c7   :  { %v373_v51 = vadd.f32 %v369_v45, %v365_v37  ;;  %v370_v52 = vmul.f32 %v3496_v50, %v3496_v50  ;;  %v763_v53 = vpack.c.bf16 %v3496_v50, %v3486_v44  ;;  %v2646_v37 = vld [vmem:[#allocation10 + $0x8] sm:$0xff]   ;;  %v2661_v44 = vld [vmem:[%s3766_s6 + $0x70] sm:$0xff]  }
 0x1c8   :  { %2753 = vrsqrt.f32 %v375_v47  ;;  %v376_v54 = vadd.f32 %v372_v48, %v368_v40  ;;  %vm393_vm1 = vcmp.eq.f32.partialorder %v375_v47, inf  ;;  %vm395_vm3 = vcmp.eq.f32.partialorder %v375_v47, 0.0  ;;  %v2648_v40 = vld [vmem:[#allocation10 + $0x18] sm:$0xff]   ;;  %v2665_v48 = vld [vmem:[#allocation13] sm:$0xff]  }
 0x1c9   :  { %2755 = vrsqrt.f32 %v373_v51  ;;  %v374_v55 = vadd.f32 %v370_v52, %v366_v41  ;;  %vm379_vm2 = vcmp.eq.f32.partialorder %v373_v51, inf  ;;  %v382_v61 = vand.u32 2147483648, %v373_v51  ;;  %v2650_v41 = vld [vmem:[%s3766_s6] sm:$0xff]   ;;  %2484 = vmatprep.subr.bf16.mxu1 %v2665_v48 }
 0x1ca   :  { %2757 = vrsqrt.f32 %v376_v54  ;;  %vm381_vm4 = vcmp.eq.f32.partialorder %v373_v51, 0.0  ;;  %v396_v1 = vand.u32 2147483648, %v375_v47  ;;  %vm400_vm5 = vcmp.eq.f32.partialorder %v376_v54, inf  ;;  %2485 = vmatpush3.bf16.msra.mxu1 %v2665_v48  ;;  %v2682_v48 = vld [vmem:[#allocation11 + $0x30] sm:$0xff]  }
 0x1cb   :  { %2759 = vrsqrt.f32 %v374_v55  ;;  %v403_v9 = vand.u32 2147483648, %v376_v54  ;;  %vm386_vm6 = vcmp.eq.f32.partialorder %v374_v55, inf  ;;  %v389_v11 = vand.u32 2147483648, %v374_v55 }
 0x1cc   :  { %vm402_vm7 = vcmp.eq.f32.partialorder %v376_v54, 0.0  ;;  %vm388_vm8 = vcmp.eq.f32.partialorder %v374_v55, 0.0 }
 0x1d2   :  { %v2754_v56 = vpop.eup %2753 }
 0x1d3   :  { %v2756_v57 = vpop.eup %2755  ;;  %v392_v58 = vmul.f32 %v2754_v56, %v375_v47  ;;  %v2674_v56 = vld [vmem:[#allocation13 + $0x18] sm:$0xff]  }
 0x1d4   :  { %v2758_v59 = vpop.eup %2757  ;;  %v378_v60 = vmul.f32 %v2756_v57, %v373_v51 }
 0x1d5   :  { %v2760_v62 = vpop.eup %2759  ;;  %v394_v63 = vsel %vm393_vm1, %v375_v47, %v392_v58  ;;  %v399_v2 = vmul.f32 %v2758_v59, %v376_v54  ;;  %v2664_v47 = vld [vmem:[%s3766_s6 + $0x38] sm:$0xff]  }
 0x1d6   :  { %v385_v7 = vmul.f32 %v2760_v62, %v374_v55  ;;  %v380_v8 = vsel %vm379_vm2, %v373_v51, %v378_v60  ;;  %v397_v25 = vsel %vm395_vm3, %v396_v1, %v394_v63 }
 0x1d7   :  { %v401_v22 = vsel %vm400_vm5, %v376_v54, %v399_v2  ;;  %v383_v30 = vsel %vm381_vm4, %v382_v61, %v380_v8  ;;  %v2667_v8 = vld [vmem:[#allocation11] sm:$0xff]  }
 0x1d8   :  { %v387_v23 = vsel %vm386_vm6, %v374_v55, %v385_v7  ;;  %v404_v26 = vsel %vm402_vm7, %v403_v9, %v401_v22  ;;  %v2671_v55 = vld [vmem:[#allocation13 + $0x10] sm:$0xff]   ;;  %v2669_v9 = vld [vmem:[#allocation11 + $0x48] sm:$0xff]  }
 0x1d9   :  { %v390_v31 = vsel %vm388_vm8, %v389_v11, %v387_v23  ;;  %v406_v32 = vpack.c.bf16 %v404_v26, %v397_v25 }
 0x1da   :  { %v405_v36 = vpack.c.bf16 %v390_v31, %v383_v30  ;;  %v2670_v30 = vld [vmem:[#allocation11 + $0x8] sm:$0xff]  }
 0x1dc   :  { %2220 = vmatmul.mubr.msk.bf16.vlgmr.msra.gmra.mrb[12].mxu0 %vm257_vm0, %v405_v36  ;;  %v2672_v36 = vld [vmem:[#allocation11 + $0x50] sm:$0xff]  }
 0x1dd   :  { %2465 = vmatpush3.bf16.msra.mxu0 %v3433_v6  ;;  %748 = vmatprep.mubr.bf16.mxu0 %v3111_v3  ;;  %v2649_v6 = vld [vmem:[%s3766_s6 + $0x40] sm:$0xff]  }
 0x1de   :  { %2466 = vmatprep.subr.bf16.mxu0 %v2646_v37 }
 0x1e1   :  { %2467 = vmatpush3.bf16.msra.mxu0 %v2646_v37 }
 0x1e2   :  { %2468 = vmatprep.subr.bf16.mxu0 %v2647_v38 }
 0x1e4   :  { %2221 = vmatmul.mubr.msk.bf16.gmra.mrb[16].mxu0 %vm257_vm0, %v406_v32 }
 0x1e5   :  { %2469 = vmatpush3.bf16.msra.mxu0 %v2647_v38  ;;  %2472 = vmatprep.mubr.msk.bf16.mxu0 %vm257_vm0, %v759_v20  ;;  %v2657_v20 = vld [vmem:[%s3766_s6 + $0x60] sm:$0xff]  }
 0x1e6   :  { %2470 = vmatprep.subr.bf16.mxu0 %v2648_v40 }
 0x1e9   :  { %2471 = vmatpush3.bf16.msra.mxu0 %v2648_v40 }
 0x1ea   :  { %2358 = vmatprep.subr.bf16.mxu0 %v2649_v6  ;;  %v2673_v6 = vld [vmem:[#allocation11 + $0x10] sm:$0xff]  }
 0x1ec   :  { %2473 = vmatmul.mubr.msk.bf16.vlgmr.msra.gmra.mrb[20].mxu0 %vm257_vm0, %v760_v18  ;;  %v2656_v18 = vld [vmem:[%s3766_s6 + $0x18] sm:$0xff]  }
 0x1ed   :  { %2476 = vmatprep.mubr.msk.bf16.mxu0 %vm257_vm0, %v761_v39  ;;  %2359 = vmatpush3.bf16.msra.mxu0 %v2650_v41  ;;  %v2675_v41 = vld [vmem:[#allocation11 + $0x58] sm:$0xff]  }
 0x1ee   :  { %2360 = vmatprep.subr.bf16.mxu0 %v2651_v43 }
 0x1f1   :  { %2361 = vmatpush3.bf16.msra.mxu0 %v2652_v14 }
 0x1f2   :  { %2362 = vmatprep.subr.bf16.mxu0 %v2653_v19 }
 0x1f4   :  { %2477 = vmatmul.mubr.msk.bf16.gmra.mrb[24].mxu0 %vm257_vm0, %v762_v33  ;;  %v641_v33 = vpop.f32.mrb[0].mxu1 }
 0x1f5   :  { %2480 = vmatprep.mubr.msk.bf16.mxu0 %vm257_vm0, %v763_v53  ;;  %2363 = vmatpush3.bf16.msra.mxu0 %v2654_v13  ;;  %v643_v34 = vpop.f32.mrb[1].mxu1  ;;  %v2668_v53 = vld [vmem:[#allocation13 + $0x8] sm:$0xff]   ;;  %v2676_v13 = vld [vmem:[#allocation11 + $0x18] sm:$0xff]  }
 0x1f6   :  { %2364 = vmatprep.subr.bf16.mxu0 %v2655_v15  ;;  %v645_v39 = vpop.f32.mrb[2].mxu1  ;;  %2486 = vmatprep.subr.bf16.mxu1 %v2668_v53 }
 0x1f7   :  { %v647_v45 = vpop.f32.mrb[3].mxu1  ;;  %2487 = vmatpush3.bf16.msra.mxu1 %v2668_v53  ;;  %v2684_v53 = vld [vmem:[#allocation11 + $0x38] sm:$0xff]  }
 0x1f8   :  { %v651_v50 = vpop.f32.mrb[4].mxu1  ;;  %2488 = vmatprep.subr.bf16.mxu1 %v2671_v55 }
 0x1f9   :  { %2365 = vmatpush3.bf16.msra.mxu0 %v2656_v18  ;;  %v653_v51 = vpop.f32.mrb[5].mxu1 }
 0x1fa   :  { %2366 = vmatprep.subr.bf16.mxu0 %v2657_v20  ;;  %v655_v52 = vpop.f32.mrb[6].mxu1  ;;  %v2677_v20 = vld [vmem:[#allocation11 + $0x60] sm:$0xff]  }
 0x1fb   :  { %v657_v54 = vpop.f32.mrb[7].mxu1  ;;  %2489 = vmatpush3.bf16.msra.mxu1 %v2671_v55 }
 0x1fc   :  { %2481 = vmatmul.mubr.msk.bf16.gmra.mrb[28].mxu0 %vm257_vm0, %v764_v49  ;;  %v2666_v49 = vld [vmem:[#allocation11 + $0x40] sm:$0xff]   ;;  %2490 = vmatprep.subr.bf16.mxu1 %v2674_v56 }
 0x1fd   :  { %2367 = vmatpush3.bf16.msra.mxu0 %v2658_v21 }
 0x1fe   :  { %2368 = vmatprep.subr.bf16.mxu0 %v2659_v24  ;;  %v2678_v24 = vld [vmem:[#allocation11 + $0x20] sm:$0xff]  }
 0x1ff   :  { %2491 = vmatpush3.bf16.msra.mxu1 %v2674_v56  ;;  %v2685_v56 = vld [vmem:[#allocation14] sm:$0xff]  }
 0x201   :  { %2369 = vmatpush3.bf16.msra.mxu0 %v2660_v28  ;;  %v2679_v28 = vld [vmem:[#allocation11 + $0x68] sm:$0xff]  }
 0x202   :  { %2370 = vmatprep.subr.bf16.mxu0 %v2661_v44  ;;  %v2680_v44 = vld [vmem:[#allocation11 + $0x28] sm:$0xff]  }
 0x205   :  { %2371 = vmatpush3.bf16.msra.mxu0 %v2662_v42 }
 0x206   :  { %2372 = vmatprep.subr.bf16.mxu0 %v2663_v46  ;;  %v2681_v46 = vld [vmem:[#allocation11 + $0x70] sm:$0xff]  }
 0x209   :  { %2373 = vmatpush3.bf16.msra.mxu0 %v2664_v47 }
 0x20a   :  { %2386 = vmatprep.subr.bf16.mxu0 %v2666_v49  ;;  %v2683_v49 = vld [vmem:[#allocation11 + $0x78] sm:$0xff]  }
 0x2af   :  { %v740_v57 = vpop.f32.mrb[12].mxu0 }
 0x2b0   :  { %v741_v58 = vadd.f32 %v740_v57, %v641_v33  ;;  %v742_v59 = vpop.f32.mrb[13].mxu0 }
 0x2b1   :  { %v743_v60 = vadd.f32 %v742_v59, %v643_v34  ;;  %v744_v61 = vpop.f32.mrb[14].mxu0  ;;  %v2687_v59 = vld [vmem:[#allocation14 + $0x10] sm:$0xff]  }
 0x2b2   :  { %v745_v62 = vadd.f32 %v744_v61, %v645_v39  ;;  %v746_v63 = vpop.f32.mrb[15].mxu0  ;;  %v2691_v61 = vld [vmem:[#allocation16 + $0x4] ss:$8 sps:$4 sm:$0xff]  }
 0x2b3   :  { %v747_v1 = vadd.f32 %v746_v63, %v647_v45  ;;  %1788 = vmatprep.subr.bf16.mxu1 %v2691_v61  ;;  %v2695_v63 = vld [vmem:[#allocation16 + $0x20] ss:$8 sps:$4 sm:$0xff]  }
 0x2b4   :  { %v3580_v2 = vpack.c.bf16 %v745_v62, %v741_v58  ;;  %v2686_v58 = vld [vmem:[#allocation14 + $0x8] sm:$0xff]   ;;  %v2692_v62 = vld [vmem:[#allocation16 + $0x10] ss:$8 sps:$4 sm:$0xff]  }
 0x2b5   :  { %v897_v7 = vpack.c.bf16 %v747_v1, %v743_v60  ;;  %v2688_v60 = vld [vmem:[#allocation14 + $0x18] sm:$0xff]   ;;  %v2701_v1 = vld [vmem:[#allocation16 + $0x40] ss:$8 sps:$4 sm:$0xff]  }
 0x2b7   :  { %v750_v11 = vpop.f32.mrb[16].mxu0  ;;  %1067 = vmatprep.mubr.bf16.mxu0 %v897_v7 }
 0x2b8   :  { %v751_v22 = vadd.f32 %v750_v11, %v651_v50  ;;  %v752_v23 = vpop.f32.mrb[17].mxu0  ;;  %1068 = vmatmul.mubr.bf16.vlgmr.msra.gmra.mrb[32].mxu0 %v3580_v2  ;;  %v2710_v11 = vld [vmem:[#allocation16 + $0x70] ss:$8 sps:$4 sm:$0xff]  }
 0x2b9   :  { %v753_v25 = vadd.f32 %v752_v23, %v653_v51  ;;  %2387 = vmatpush3.bf16.msra.mxu0 %v2667_v8  ;;  %v754_v26 = vpop.f32.mrb[18].mxu0  ;;  %v2707_v8 = vld [vmem:[#allocation16 + $0x60] ss:$8 sps:$4 sm:$0xff]   ;;  %v2716_v23 = vld [vmem:[#allocation16 + $0x84] ss:$8 sps:$4 sm:$0xff]  }
 0x2ba   :  { %v755_v31 = vadd.f32 %v754_v26, %v655_v52  ;;  %v756_v32 = vpop.f32.mrb[19].mxu0  ;;  %2388 = vmatprep.subr.bf16.mxu0 %v2669_v9  ;;  %v2712_v9 = vld [vmem:[#allocation16 + $0x74] ss:$8 sps:$4 sm:$0xff]   ;;  %v2717_v26 = vld [vmem:[#allocation17 + $0x8] sm:$0xff]  }
 0x2bb   :  { %v757_v37 = vadd.f32 %v756_v32, %v657_v54  ;;  %v2721_v32 = vld [vmem:[#allocation17 + $0x10] sm:$0xff]  }
 0x2bc   :  { %v3583_v38 = vpack.c.bf16 %v755_v31, %v751_v22  ;;  %v2713_v22 = vld [vmem:[#allocation17] sm:$0xff]   ;;  %v2718_v31 = vld [vmem:[#allocation16 + $0x90] ss:$8 sps:$4 sm:$0xff]  }
 0x2bd   :  { %v899_v40 = vpack.c.bf16 %v757_v37, %v753_v25  ;;  %2389 = vmatpush3.bf16.msra.mxu0 %v2670_v30  ;;  %v2714_v25 = vld [vmem:[#allocation16 + $0x80] ss:$8 sps:$4 sm:$0xff]   ;;  %v2720_v30 = vld [vmem:[#allocation16 + $0x94] ss:$8 sps:$4 sm:$0xff]  }
 0x2be   :  { %2390 = vmatprep.subr.bf16.mxu0 %v2672_v36  ;;  %v2724_v36 = vld [vmem:[#allocation16 + $0xa4] ss:$8 sps:$4 sm:$0xff]   ;;  %v2722_v37 = vld [vmem:[#allocation16 + $0xa0] ss:$8 sps:$4 sm:$0xff]  }
 0x2bf   :  { %v2474_v43 = vpop.f32.mrb[20].mxu0  ;;  %1075 = vmatprep.mubr.bf16.mxu0 %v899_v40 }
 0x2c0   :  { %v849_v14 = vpop.f32.mrb[21].mxu0  ;;  %1076 = vmatmul.mubr.bf16.gmra.mrb[36].mxu0 %v3583_v38 }
 0x2c1   :  { %2391 = vmatpush3.bf16.msra.mxu0 %v2673_v6  ;;  %v2475_v19 = vpop.f32.mrb[22].mxu0  ;;  %1255 = vmatprep.mubr.bf16.mxu0 %v897_v7  ;;  %v2709_v7 = vld [vmem:[#allocation16 + $0x64] ss:$8 sps:$4 sm:$0xff]   ;;  %v2728_v6 = vld [vmem:[#allocation16 + $0xb4] ss:$8 sps:$4 sm:$0xff]  }
 0x2c2   :  { %v1277_v15 = vpack.c.bf16 %v2475_v19, %v2474_v43  ;;  %v852_v18 = vpop.f32.mrb[23].mxu0  ;;  %2392 = vmatprep.subr.bf16.mxu0 %v2675_v41  ;;  %v2731_v41 = vld [vmem:[#allocation16 + $0xc4] ss:$8 sps:$4 sm:$0xff]   ;;  %v2729_v43 = vld [vmem:[#allocation16 + $0xc0] ss:$8 sps:$4 sm:$0xff]  }
 0x2c3   :  { %v1276_v21 = vpack.c.bf16 %v852_v18, %v849_v14  ;;  %v2734_v14 = vld [vmem:[#allocation16 + $0xd4] ss:$8 sps:$4 sm:$0xff]   ;;  %v2732_v19 = vld [vmem:[#allocation16 + $0xd0] ss:$8 sps:$4 sm:$0xff]  }
 0x2c4   :  { %v2740_v18 = vld [vmem:[#allocation16 + $0xf4] ss:$8 sps:$4 sm:$0xff]  }
 0x2c5   :  { %2393 = vmatpush3.bf16.msra.mxu0 %v2676_v13  ;;  %2492 = vmatprep.mubr.msk.bf16.mxu1 %vm257_vm0, %v1276_v21  ;;  %v2737_v13 = vld [vmem:[#allocation16 + $0xe4] ss:$8 sps:$4 sm:$0xff]  }
 0x2c6   :  { %2493 = vmatmul.mubr.msk.bf16.vlgmr.msra.gmra.mrb[8].mxu1 %vm257_vm0, %v1277_v15  ;;  %2394 = vmatprep.subr.bf16.mxu0 %v2677_v20  ;;  %v2735_v15 = vld [vmem:[#allocation16 + $0xe0] ss:$8 sps:$4 sm:$0xff]   ;;  %v2738_v20 = vld [vmem:[#allocation16 + $0xf0] ss:$8 sps:$4 sm:$0xff]   ;;  %v2743_v21 = vld [vmem:[%s3772_s12 + $0x4] ss:$8 sps:$4 sm:$0xff]  }
 0x2c7   :  { %v2478_v33 = vpop.f32.mrb[24].mxu0 }
 0x2c8   :  { %v865_v34 = vpop.f32.mrb[25].mxu0 }
 0x2c9   :  { %2395 = vmatpush3.bf16.msra.mxu0 %v2678_v24  ;;  %v2479_v39 = vpop.f32.mrb[26].mxu0  ;;  %v2741_v24 = vld [vmem:[%s3772_s12] ss:$8 sps:$4 sm:$0xff]  }
 0x2ca   :  { %v1279_v45 = vpack.c.bf16 %v2479_v39, %v2478_v33  ;;  %v868_v42 = vpop.f32.mrb[27].mxu0  ;;  %2396 = vmatprep.subr.bf16.mxu0 %v2679_v28  ;;  %v2746_v28 = vld [vmem:[%s3772_s12 + $0x14] ss:$8 sps:$4 sm:$0xff]   ;;  %v2744_v33 = vld [vmem:[%s3772_s12 + $0x10] ss:$8 sps:$4 sm:$0xff]  }
 0x2cb   :  { %v1278_v47 = vpack.c.bf16 %v868_v42, %v865_v34  ;;  %v2749_v34 = vld [vmem:[%s3772_s12 + $0x24] ss:$8 sps:$4 sm:$0xff]   ;;  %v2752_v39 = vld [vmem:[%s3772_s12 + $0x34] ss:$8 sps:$4 sm:$0xff]  }
 0x2cd   :  { %2397 = vmatpush3.bf16.msra.mxu0 %v2680_v44  ;;  %2496 = vmatprep.mubr.msk.bf16.mxu1 %vm257_vm0, %v1278_v47 }
 0x2ce   :  { %2497 = vmatmul.mubr.msk.bf16.gmra.mrb[12].mxu1 %vm257_vm0, %v1279_v45  ;;  %2398 = vmatprep.subr.bf16.mxu0 %v2681_v46  ;;  %v2232_v45 = vld [vmem:[%s3767_s7] ss:$0 sm:$0xff] }
 0x2cf   :  { %v2482_v50 = vpop.f32.mrb[28].mxu0 }
 0x2d0   :  { %v881_v51 = vpop.f32.mrb[29].mxu0 }
 0x2d1   :  { %2399 = vmatpush3.bf16.msra.mxu0 %v2682_v48  ;;  %v2483_v52 = vpop.f32.mrb[30].mxu0 }
 0x2d2   :  { %v1281_v54 = vpack.c.bf16 %v2483_v52, %v2482_v50  ;;  %v884_v55 = vpop.f32.mrb[31].mxu0  ;;  %2400 = vmatprep.subr.bf16.mxu0 %v2683_v49 }
 0x2d3   :  { %v1280_v57 = vpack.c.bf16 %v884_v55, %v881_v51 }
 0x2d5   :  { %2401 = vmatpush3.bf16.msra.mxu0 %v2684_v53  ;;  %2500 = vmatprep.mubr.msk.bf16.mxu1 %vm257_vm0, %v1280_v57 }
 0x2d6   :  { %2501 = vmatmul.mubr.msk.bf16.gmra.mrb[16].mxu1 %vm257_vm0, %v1281_v54  ;;  %2504 = vmatprep.subr.bf16.mxu0 %v2685_v56 }
 0x2d7   :  { %1820 = vmatprep.mubr.bf16.mxu1 %v3426_v0  ;;  %v2689_v0 = vld [vmem:[#allocation16] ss:$8 sps:$4 sm:$0xff]  }
 0x2d8   :  { %1256 = vmatmul.mubr.bf16.vlgmr.msra.gmra.mrb[40].mxu0 %v3580_v2  ;;  %1789 = vmatpush1.bf16.msra.mxu1 %v2689_v0  ;;  %v2704_v2 = vld [vmem:[#allocation16 + $0x50] ss:$8 sps:$4 sm:$0xff]  }
 0x2d9   :  { %1263 = vmatprep.mubr.bf16.mxu0 %v899_v40  ;;  %2505 = vmatpush3.bf16.msra.mxu0 %v2685_v56  ;;  %v2726_v40 = vld [vmem:[#allocation16 + $0xb0] ss:$8 sps:$4 sm:$0xff]  }
 0x2da   :  { %2506 = vmatprep.subr.bf16.mxu0 %v2686_v58 }
 0x2dd   :  { %2507 = vmatpush3.bf16.msra.mxu0 %v2686_v58 }
 0x2de   :  { %2508 = vmatprep.subr.bf16.mxu0 %v2687_v59 }
 0x2e0   :  { %1264 = vmatmul.mubr.bf16.gmra.mrb[44].mxu0 %v3583_v38  ;;  %v2725_v38 = vld [vmem:[#allocation17 + $0x18] sm:$0xff]  }
 0x2e1   :  { %2509 = vmatpush3.bf16.msra.mxu0 %v2687_v59  ;;  %2512 = vmatprep.mubr.msk.bf16.mxu0 %vm257_vm0, %v3372_v5  ;;  %v2694_v5 = vld [vmem:[#allocation16 + $0x14] ss:$8 sps:$4 sm:$0xff]  }
 0x2e2   :  { %2510 = vmatprep.subr.bf16.mxu0 %v2688_v60  ;;  %1790 = vmatprep.subr.bf16.mxu1 %v2694_v5 }
 0x2e3   :  { %1791 = vmatpush1.bf16.msra.mxu1 %v2692_v62 }
 0x2e5   :  { %2511 = vmatpush3.bf16.msra.mxu0 %v2688_v60 }
 0x2e6   :  { %2524 = vmatprep.subr.bf16.mxu0 %v2713_v22 }
 0x2e8   :  { %2513 = vmatmul.mubr.msk.bf16.vlgmr.msra.gmra.mrb[48].mxu0 %vm257_vm0, %v3388_v16  ;;  %v2697_v16 = vld [vmem:[#allocation16 + $0x24] ss:$8 sps:$4 sm:$0xff]  }
 0x2e9   :  { %2516 = vmatprep.mubr.msk.bf16.mxu0 %vm257_vm0, %v3390_v17  ;;  %1792 = vmatprep.subr.bf16.mxu1 %v2697_v16  ;;  %v2700_v17 = vld [vmem:[#allocation16 + $0x34] ss:$8 sps:$4 sm:$0xff]  }
 0x2ea   :  { %1793 = vmatpush1.bf16.msra.mxu1 %v2695_v63  ;;  %2525 = vmatpush3.bf16.msra.mxu0 %v2713_v22 }
 0x2eb   :  { %1794 = vmatprep.subr.bf16.mxu1 %v2700_v17  ;;  %2526 = vmatprep.subr.bf16.mxu0 %v2717_v26 }
 0x2ee   :  { %2527 = vmatpush3.bf16.msra.mxu0 %v2717_v26 }
 0x2ef   :  { %2528 = vmatprep.subr.bf16.mxu0 %v2721_v32 }
 0x2f0   :  { %2517 = vmatmul.mubr.msk.bf16.gmra.mrb[52].mxu0 %vm257_vm0, %v3408_v27  ;;  %v2698_v27 = vld [vmem:[#allocation16 + $0x30] ss:$8 sps:$4 sm:$0xff]  }
 0x2f1   :  { %2520 = vmatprep.mubr.msk.bf16.mxu0 %vm257_vm0, %v3410_v29  ;;  %1795 = vmatpush1.bf16.msra.mxu1 %v2698_v27  ;;  %v2703_v29 = vld [vmem:[#allocation16 + $0x44] ss:$8 sps:$4 sm:$0xff]  }
 0x2f2   :  { %1796 = vmatprep.subr.bf16.mxu1 %v2703_v29  ;;  %2529 = vmatpush3.bf16.msra.mxu0 %v2721_v32 }
 0x2f3   :  { %2530 = vmatprep.subr.bf16.mxu0 %v2725_v38 }
 0x2f5   :  { %1797 = vmatpush1.bf16.msra.mxu1 %v2701_v1 }
 0x2f6   :  { %2531 = vmatpush3.bf16.msra.mxu0 %v2725_v38 }
 0x2f8   :  { %2521 = vmatmul.mubr.msk.bf16.gmra.mrb[56].mxu0 %vm257_vm0, %v3422_v35  ;;  %v2706_v35 = vld [vmem:[#allocation16 + $0x54] ss:$8 sps:$4 sm:$0xff]  }
 0x2f9   :  { %1798 = vmatprep.subr.bf16.mxu1 %v2706_v35  ;;  %v2249_v35 = vld [vmem:[%s3769_s9] ss:$0 sm:$0xff]  ;;  %s3112_s9 = smov [#allocation20]  }
 0x2fa   :  { %1799 = vmatpush1.bf16.msra.mxu1 %v2704_v2  ;;  %s2114_s18 = sshll.u32 %s3112_s9, 4  ;;  %s2115_s18 = int_to_ptr.vmem [resolvable:$true] %s2114_s18 }
 0x2fb   :  { %1800 = vmatprep.subr.bf16.mxu1 %v2709_v7  ;;  %s2989_s6 = scalar_lea.vmem %s2115_s18, 512  ;;  %p2994_p11 = scmp.lt.s32.totalorder %s2115_s18, %s2115_s18 }
 0x2fc   :  { %p2990_p10 = scmp.ne.s32.totalorder %s2115_s18, %s2989_s6  ;;  %p2995_p12 = scmp.lt.s32.totalorder %s2989_s6, %s2989_s6 }
 0x2fe   :  { %1801 = vmatpush1.bf16.msra.mxu1 %v2707_v8  ;;  %p2996_p13 = por %p2995_p12, %p2994_p11 }
 0x2ff   :  { %1802 = vmatprep.subr.bf16.mxu1 %v2712_v9 }
 0x300   :  { %p2997_p0 = pnand %p2996_p13, %p2990_p10 }
 0x302   :  { %1803 = vmatpush1.bf16.msra.mxu1 %v2710_v11 }
 0x303   :  { %1804 = vmatprep.subr.bf16.mxu1 %v2716_v23 }
 0x306   :  { %1805 = vmatpush1.bf16.msra.mxu1 %v2714_v25 }
 0x307   :  { %1806 = vmatprep.subr.bf16.mxu1 %v2720_v30 }
 0x30a   :  { %1807 = vmatpush1.bf16.msra.mxu1 %v2718_v31 }
 0x30b   :  { %1808 = vmatprep.subr.bf16.mxu1 %v2724_v36 }
 0x30e   :  { %1809 = vmatpush1.bf16.msra.mxu1 %v2722_v37 }
 0x30f   :  { %1810 = vmatprep.subr.bf16.mxu1 %v2728_v6 }
 0x312   :  { %1811 = vmatpush1.bf16.msra.mxu1 %v2726_v40 }
 0x313   :  { %1812 = vmatprep.subr.bf16.mxu1 %v2731_v41 }
 0x316   :  { %1813 = vmatpush1.bf16.msra.mxu1 %v2729_v43 }
 0x317   :  { %1814 = vmatprep.subr.bf16.mxu1 %v2734_v14 }
 0x31a   :  { %1815 = vmatpush1.bf16.msra.mxu1 %v2732_v19 }
 0x31b   :  { %1816 = vmatprep.subr.bf16.mxu1 %v2737_v13 }
 0x31e   :  { %1817 = vmatpush1.bf16.msra.mxu1 %v2735_v15 }
 0x31f   :  { %1818 = vmatprep.subr.bf16.mxu1 %v2740_v18 }
 0x322   :  { %1819 = vmatpush1.bf16.msra.mxu1 %v2738_v20 }
 0x323   :  { %1887 = vmatprep.subr.bf16.mxu1 %v2743_v21 }
 0x325   :  { %1821 = vmatmul.mubr.bf16.vlgmr.msra.gmra.mrb[20].mxu1 %v3430_v4  ;;  %v2747_v4 = vld [vmem:[%s3772_s12 + $0x20] ss:$8 sps:$4 sm:$0xff]  }
 0x326   :  { %1888 = vmatpush1.bf16.msra.mxu1 %v2741_v24  ;;  %1830 = vmatprep.mubr.bf16.mxu1 %v3436_v10  ;;  %v2750_v10 = vld [vmem:[%s3772_s12 + $0x30] ss:$8 sps:$4 sm:$0xff]  }
 0x327   :  { %1889 = vmatprep.subr.bf16.mxu1 %v2746_v28 }
 0x32a   :  { %1890 = vmatpush1.bf16.msra.mxu1 %v2744_v33 }
 0x32b   :  { %1891 = vmatprep.subr.bf16.mxu1 %v2749_v34 }
 0x32d   :  { %1831 = vmatmul.mubr.bf16.gmra.mrb[24].mxu1 %v3438_v12 }
 0x32e   :  { %1892 = vmatpush1.bf16.msra.mxu1 %v2747_v4  ;;  %1919 = vmatprep.mubr.bf16.mxu1 %v3111_v3 }
 0x32f   :  { %1893 = vmatprep.subr.bf16.mxu1 %v2752_v39 }
 0x332   :  { %1894 = vmatpush1.bf16.msra.mxu1 %v2750_v10 }
 0x38b   :  { %v2374_v44 = vpop.f32.mrb[32].mxu0 }
 0x38c   :  { %v2375_v12 = vpop.f32.mrb[33].mxu0 }
 0x38d   :  { %v2376_v42 = vadd.f32 %v2375_v12, %v2374_v44  ;;  %v2377_v46 = vpop.f32.mrb[34].mxu0 }
 0x38e   :  { %v2378_v47 = vpop.f32.mrb[35].mxu0 }
 0x38f   :  { %v1070_v48 = vadd.f32 %v2376_v42, %v2232_v45  ;;  %v2379_v49 = vadd.f32 %v2378_v47, %v2377_v46 }
 0x391   :  { %1084 = vst [vmem:[#allocation19] sm:$0xff] %v1070_v48  ;;  %v1073_v50 = vadd.f32 %v2379_v49, %v2232_v45 }
 0x393   :  { %1085 = vst [vmem:[#allocation19 + $0x8] sm:$0xff] %v1073_v50  ;;  %v2380_v51 = vpop.f32.mrb[36].mxu0 }
 0x394   :  { %v2381_v52 = vpop.f32.mrb[37].mxu0 }
 0x395   :  { %v2382_v53 = vadd.f32 %v2381_v52, %v2380_v51  ;;  %v2383_v54 = vpop.f32.mrb[38].mxu0 }
 0x396   :  { %v2384_v55 = vpop.f32.mrb[39].mxu0 }
 0x397   :  { %v1078_v56 = vadd.f32 %v2382_v53, %v2232_v45  ;;  %v2385_v57 = vadd.f32 %v2384_v55, %v2383_v54 }
 0x399   :  { %1086 = vst [vmem:[#allocation19 + $0x10] sm:$0xff] %v1078_v56  ;;  %v1081_v58 = vadd.f32 %v2385_v57, %v2232_v45  ;;  %v2494_v59 = vpop.f32.mrb[8].mxu1 }
 0x39a   :  { %1415 = vst [vmem:[#allocation22 + $0x10] sm:$0xff] %v2494_v59  ;;  %v1366_v60 = vpop.f32.mrb[9].mxu1 }
 0x39b   :  { %1087 = vst [vmem:[#allocation19 + $0x18] sm:$0xff] %v1081_v58  ;;  %1413 = vst [vmem:[#allocation22] sm:$0xff] %v1366_v60  ;;  %v2495_v0 = vpop.f32.mrb[10].mxu1 }
 0x39c   :  { %1416 = vst [vmem:[#allocation22 + $0x18] sm:$0xff] %v2495_v0  ;;  %v1369_v61 = vpop.f32.mrb[11].mxu1 }
 0x39d   :  { %1414 = vst [vmem:[#allocation22 + $0x8] sm:$0xff] %v1369_v61 }
 0x3a1   :  { %v2498_v5 = vpop.f32.mrb[12].mxu1 }
 0x3a2   :  { %1419 = vst [vmem:[#allocation22 + $0x30] sm:$0xff] %v2498_v5  ;;  %v1382_v62 = vpop.f32.mrb[13].mxu1 }
 0x3a3   :  { %1417 = vst [vmem:[#allocation22 + $0x20] sm:$0xff] %v1382_v62  ;;  %v2499_v16 = vpop.f32.mrb[14].mxu1 }
 0x3a4   :  { %1420 = vst [vmem:[#allocation22 + $0x38] sm:$0xff] %v2499_v16  ;;  %v1385_v63 = vpop.f32.mrb[15].mxu1 }
 0x3a5   :  { %1418 = vst [vmem:[#allocation22 + $0x28] sm:$0xff] %v1385_v63 }
 0x3a9   :  { %v2502_v17 = vpop.f32.mrb[16].mxu1 }
 0x3aa   :  { %1423 = vst [vmem:[#allocation22 + $0x50] sm:$0xff] %v2502_v17  ;;  %v1398_v27 = vpop.f32.mrb[17].mxu1 }
 0x3ab   :  { %v2402_v29 = vpop.f32.mrb[40].mxu0  ;;  %1421 = vst [vmem:[#allocation22 + $0x40] sm:$0xff] %v1398_v27  ;;  %v2503_v1 = vpop.f32.mrb[18].mxu1 }
 0x3ac   :  { %v2403_v2 = vpop.f32.mrb[41].mxu0  ;;  %1424 = vst [vmem:[#allocation22 + $0x58] sm:$0xff] %v2503_v1  ;;  %v1401_v7 = vpop.f32.mrb[19].mxu1 }
 0x3ad   :  { %v2404_v8 = vadd.f32 %v2403_v2, %v2402_v29  ;;  %v2405_v9 = vpop.f32.mrb[42].mxu0  ;;  %1422 = vst [vmem:[#allocation22 + $0x48] sm:$0xff] %v1401_v7 }
 0x3ae   :  { %v2406_v11 = vpop.f32.mrb[43].mxu0 }
 0x3af   :  { %v1258_v22 = vadd.f32 %v2404_v8, %v2249_v35  ;;  %v2407_v23 = vadd.f32 %v2406_v11, %v2405_v9 }
 0x3b1   :  { %1272 = vst [vmem:[#allocation20] sm:$0xff] %v1258_v22  ;;  %v1261_v25 = vadd.f32 %v2407_v23, %v2249_v35 }
 0x3b3   :  { %1273 = vst [vmem:[#allocation20 + $0x8] sm:$0xff] %v1261_v25  ;;  %v2408_v26 = vpop.f32.mrb[44].mxu0 }
 0x3b4   :  { %v2409_v30 = vpop.f32.mrb[45].mxu0 }
 0x3b5   :  { %v2410_v31 = vadd.f32 %v2409_v30, %v2408_v26  ;;  %v2411_v32 = vpop.f32.mrb[46].mxu0 }
 0x3b6   :  { %v2412_v36 = vpop.f32.mrb[47].mxu0 }
 0x3b7   :  { %v1266_v37 = vadd.f32 %v2410_v31, %v2249_v35  ;;  %v2413_v38 = vadd.f32 %v2412_v36, %v2411_v32 }
 0x3b9   :  { %1274 = vst [vmem:[#allocation20 + $0x10] sm:$0xff] %v1266_v37  ;;  %v1269_v40 = vadd.f32 %v2413_v38, %v2249_v35 }
 0x3bb   :  { %1275 = vst [vmem:[#allocation20 + $0x18] sm:$0xff] %v1269_v40  ;;  %v2514_v6 = vpop.f32.mrb[48].mxu0 }
 0x3bc   :  { %v1491_v41 = vpop.f32.mrb[49].mxu0  ;;  %v1540_v18 = vmul.f32 %v2514_v6, %v2514_v6 }
 0x3bd   :  { %v2515_v43 = vpop.f32.mrb[50].mxu0  ;;  %v1538_v24 = vmul.f32 %v1491_v41, %v1491_v41 }
 0x3be   :  { %v1941_v14 = vpack.c.bf16 %v2515_v43, %v2514_v6  ;;  %v1494_v19 = vpop.f32.mrb[51].mxu0  ;;  %v1541_v34 = vmul.f32 %v2515_v43, %v2515_v43 }
 0x3bf   :  { %v1940_v13 = vpack.c.bf16 %v1494_v19, %v1491_v41  ;;  %v1539_v45 = vmul.f32 %v1494_v19, %v1494_v19 }
 0x3c1   :  { %2532 = vmatprep.mubr.msk.bf16.mxu0 %vm257_vm0, %v1940_v13 }
 0x3c2   :  { %2533 = vmatmul.mubr.msk.bf16.vlgmr.msra.gmra.mrb[60].mxu0 %vm257_vm0, %v1941_v14 }
 0x3c3   :  { %v2518_v15 = vpop.f32.mrb[52].mxu0 }
 0x3c4   :  { %v1544_v20 = vmul.f32 %v2518_v15, %v2518_v15  ;;  %v1507_v21 = vpop.f32.mrb[53].mxu0 }
 0x3c5   :  { %v1542_v28 = vmul.f32 %v1507_v21, %v1507_v21  ;;  %v2519_v33 = vpop.f32.mrb[54].mxu0 }
 0x3c6   :  { %v1548_v4 = vadd.f32 %v1544_v20, %v1540_v18  ;;  %v1545_v10 = vmul.f32 %v2519_v33, %v2519_v33  ;;  %v1943_v39 = vpack.c.bf16 %v2519_v33, %v2518_v15  ;;  %v1510_v44 = vpop.f32.mrb[55].mxu0 }
 0x3c7   :  { %v1546_v12 = vadd.f32 %v1542_v28, %v1538_v24  ;;  %v1543_v42 = vmul.f32 %v1510_v44, %v1510_v44  ;;  %v1942_v46 = vpack.c.bf16 %v1510_v44, %v1507_v21 }
 0x3c8   :  { %v1549_v47 = vadd.f32 %v1545_v10, %v1541_v34 }
 0x3c9   :  { %v1547_v48 = vadd.f32 %v1543_v42, %v1539_v45  ;;  %2536 = vmatprep.mubr.msk.bf16.mxu0 %vm257_vm0, %v1942_v46 }
 0x3ca   :  { %2537 = vmatmul.mubr.msk.bf16.gmra.mrb[64].mxu0 %vm257_vm0, %v1943_v39 }
 0x3cb   :  { %v2522_v49 = vpop.f32.mrb[56].mxu0 }
 0x3cc   :  { %v1552_v50 = vmul.f32 %v2522_v49, %v2522_v49  ;;  %v1523_v51 = vpop.f32.mrb[57].mxu0 }
 0x3cd   :  { %v1550_v52 = vmul.f32 %v1523_v51, %v1523_v51  ;;  %v2523_v53 = vpop.f32.mrb[58].mxu0 }
 0x3ce   :  { %v1556_v54 = vadd.f32 %v1552_v50, %v1548_v4  ;;  %v1553_v55 = vmul.f32 %v2523_v53, %v2523_v53  ;;  %v1945_v56 = vpack.c.bf16 %v2523_v53, %v2522_v49  ;;  %v1526_v57 = vpop.f32.mrb[59].mxu0 }
 0x3cf   :  { %v1554_v58 = vadd.f32 %v1550_v52, %v1546_v12  ;;  %v1551_v59 = vmul.f32 %v1526_v57, %v1526_v57  ;;  %v1944_v60 = vpack.c.bf16 %v1526_v57, %v1523_v51 }
 0x3d0   :  { %2761 = vrsqrt.f32 %v1556_v54  ;;  %v1557_v0 = vadd.f32 %v1553_v55, %v1549_v47  ;;  %vm1574_vm9 = vcmp.eq.f32.partialorder %v1556_v54, inf  ;;  %vm1576_vm11 = vcmp.eq.f32.partialorder %v1556_v54, 0.0 }
 0x3d1   :  { %2763 = vrsqrt.f32 %v1554_v58  ;;  %v1555_v61 = vadd.f32 %v1551_v59, %v1547_v48  ;;  %2540 = vmatprep.mubr.msk.bf16.mxu0 %vm257_vm0, %v1944_v60  ;;  %vm1560_vm10 = vcmp.eq.f32.partialorder %v1554_v58, inf  ;;  %v1563_v27 = vand.u32 2147483648, %v1554_v58 }
 0x3d2   :  { %2765 = vrsqrt.f32 %v1557_v0  ;;  %2541 = vmatmul.mubr.msk.bf16.gmra.mrb[68].mxu0 %vm257_vm0, %v1945_v56  ;;  %vm1562_vm12 = vcmp.eq.f32.partialorder %v1554_v58, 0.0  ;;  %v1577_v35 = vand.u32 2147483648, %v1556_v54  ;;  %vm1581_vm13 = vcmp.eq.f32.partialorder %v1557_v0, inf }
 0x3d3   :  { %2767 = vrsqrt.f32 %v1555_v61  ;;  %v1584_v9 = vand.u32 2147483648, %v1557_v0  ;;  %vm1567_vm14 = vcmp.eq.f32.partialorder %v1555_v61, inf  ;;  %v1570_v11 = vand.u32 2147483648, %v1555_v61 }
 0x3d4   :  { %vm1583_vm15 = vcmp.eq.f32.partialorder %v1557_v0, 0.0  ;;  %vm1569_vm1 = vcmp.eq.f32.partialorder %v1555_v61, 0.0 }
 0x3da   :  { %v2762_v5 = vpop.eup %2761 }
 0x3db   :  { %v2764_v62 = vpop.eup %2763  ;;  %v1573_v16 = vmul.f32 %v2762_v5, %v1556_v54 }
 0x3dc   :  { %v2766_v63 = vpop.eup %2765  ;;  %v1559_v17 = vmul.f32 %v2764_v62, %v1554_v58 }
 0x3dd   :  { %v2768_v29 = vpop.eup %2767  ;;  %v1575_v1 = vsel %vm1574_vm9, %v1556_v54, %v1573_v16  ;;  %v1580_v2 = vmul.f32 %v2766_v63, %v1557_v0 }
 0x3de   :  { %v1566_v7 = vmul.f32 %v2768_v29, %v1555_v61  ;;  %v1561_v8 = vsel %vm1560_vm10, %v1554_v58, %v1559_v17  ;;  %v1578_v25 = vsel %vm1576_vm11, %v1577_v35, %v1575_v1 }
 0x3df   :  { %v1582_v22 = vsel %vm1581_vm13, %v1557_v0, %v1580_v2  ;;  %v1564_v30 = vsel %vm1562_vm12, %v1563_v27, %v1561_v8 }
 0x3e0   :  { %v1568_v23 = vsel %vm1567_vm14, %v1555_v61, %v1566_v7  ;;  %v1585_v26 = vsel %vm1583_vm15, %v1584_v9, %v1582_v22 }
 0x3e1   :  { %v1571_v31 = vsel %vm1569_vm1, %v1570_v11, %v1568_v23  ;;  %v1587_v32 = vpack.c.bf16 %v1585_v26, %v1578_v25 }
 0x3e2   :  { %v1586_v36 = vpack.c.bf16 %v1571_v31, %v1564_v30 }
 0x3e4   :  { %2326 = vmatmul.mubr.msk.bf16.vlgmr.msra.gmra.mrb[20].mxu1 %vm257_vm0, %v1586_v36 }
 0x3e5   :  { %1929 = vmatprep.mubr.bf16.mxu1 %v3111_v3 }
 0x3ec   :  { %2327 = vmatmul.mubr.msk.bf16.gmra.mrb[24].mxu1 %vm257_vm0, %v1587_v32 }
 0x3ed   :  { %3000 = shalt.err (!%p2997_p0)
}
 0x3ee   :  { %s3001_s8 = scalar_lea.hbm %s3776_s16, 512 }
 0x3ef   :  { %p3002_p1 = scmp.ne.s32.totalorder %s3776_s16, %s3001_s8  ;;  %p3005_p2 = scmp.lt.u32.totalorder %s3001_s8, %s3776_s16 }
 0x3f1   :  { %p3007_p3 = pnand %p3005_p2, %p3002_p1 }
 0x3f3   :  { %3010 = shalt.err (!%p3007_p3)
}
 0x3f4   :  { %2120 = dma.vmem_to_hbm [thread:$0]  %s2115_s18, 512, %s3776_s16, [#allocation21], %s3100_s1, %s3100_s1, %s3101_s28  }
 0x3f5   :  { %s3011_s10 = scalar_lea.vmem %s2103_s26, 512  ;;  %p3016_p5 = scmp.lt.s32.totalorder %s2103_s26, %s2103_s26 }
 0x3f6   :  { %p3012_p4 = scmp.ne.s32.totalorder %s2103_s26, %s3011_s10  ;;  %p3017_p6 = scmp.lt.s32.totalorder %s3011_s10, %s3011_s10 }
 0x3f8   :  { %p3018_p7 = por %p3017_p6, %p3016_p5 }
 0x3fa   :  { %p3019_p8 = pnand %p3018_p7, %p3012_p4 }
 0x3fc   :  { %3022 = shalt.err (!%p3019_p8)
}
 0x3fd   :  { %s3023_s23 = scalar_lea.hbm %s3775_s15, 512 }
 0x3fe   :  { %p3024_p9 = scmp.ne.s32.totalorder %s3775_s15, %s3023_s23  ;;  %p3027_p10 = scmp.lt.u32.totalorder %s3023_s23, %s3775_s15 }
 0x400   :  { %p3029_p11 = pnand %p3027_p10, %p3024_p9 }
 0x402   :  { %3032 = shalt.err (!%p3029_p11)
}
 0x403   :  { %2108 = dma.vmem_to_hbm [thread:$0]  %s2103_s26, 512, %s3775_s15, [#allocation4], %s3100_s1, %s3100_s1, %s3101_s28  }
 0x404   :  { %s3114_s12 = smov [#allocation22]  }
 0x405   :  { %s2126_s9 = sshll.u32 %s3114_s12, 4  ;;  %s2127_s9 = int_to_ptr.vmem [resolvable:$true] %s2126_s9 }
 0x406   :  { %s3033_s18 = scalar_lea.vmem %s2127_s9, 1536  ;;  %p3038_p13 = scmp.lt.s32.totalorder %s2127_s9, %s2127_s9 }
 0x407   :  { %p3034_p12 = scmp.ne.s32.totalorder %s2127_s9, %s3033_s18  ;;  %p3039_p0 = scmp.lt.s32.totalorder %s3033_s18, %s3033_s18 }
 0x409   :  { %p3040_p1 = por %p3039_p0, %p3038_p13 }
 0x40b   :  { %p3041_p2 = pnand %p3040_p1, %p3034_p12 }
 0x40d   :  { %3044 = shalt.err (!%p3041_p2)
}
 0x40e   :  { %s3045_s27 = scalar_lea.hbm %s3777_s17, 1536 }
 0x40f   :  { %p3046_p3 = scmp.ne.s32.totalorder %s3777_s17, %s3045_s27  ;;  %p3049_p4 = scmp.lt.u32.totalorder %s3045_s27, %s3777_s17 }
 0x411   :  { %p3051_p5 = pnand %p3049_p4, %p3046_p3 }
 0x413   :  { %3054 = shalt.err (!%p3051_p5)
}
 0x414   :  { %2132 = dma.vmem_to_hbm [thread:$0]  %s2127_s9, 1536, %s3777_s17, [#allocation21], %s3100_s1, %s3100_s1, %s3101_s28  }
 0x415   :  { %s3802_s19 = sld [smem:[#allocation39_spill]]  ;;  %s3115_s22 = smov [#allocation23]  }
 0x416   :  { %s2138_s15 = sshll.u32 %s3115_s22, 4  ;;  %s2139_s15 = int_to_ptr.vmem [resolvable:$true] %s2138_s15 }
 0x417   :  { %s3055_s26 = scalar_lea.vmem %s2139_s15, 1024  ;;  %p3060_p7 = scmp.lt.s32.totalorder %s2139_s15, %s2139_s15 }
 0x418   :  { %p3056_p6 = scmp.ne.s32.totalorder %s2139_s15, %s3055_s26  ;;  %p3061_p8 = scmp.lt.s32.totalorder %s3055_s26, %s3055_s26 }
 0x41a   :  { %p3062_p9 = por %p3061_p8, %p3060_p7 }
 0x41c   :  { %p3063_p10 = pnand %p3062_p9, %p3056_p6 }
 0x495   :  { %v2534_v3 = vpop.f32.mrb[60].mxu0 }
 0x496   :  { %2087 = vst.msk [vmem:[%s3802_s19 + $0x10] sm:$0xff] %vm257_vm0, %v2534_v3  ;;  %v2030_v37 = vpop.f32.mrb[61].mxu0 }
 0x497   :  { %2085 = vst.msk [vmem:[%s3802_s19] sm:$0xff] %vm257_vm0, %v2030_v37  ;;  %v2535_v38 = vpop.f32.mrb[62].mxu0 }
 0x498   :  { %2088 = vst.msk [vmem:[%s3802_s19 + $0x18] sm:$0xff] %vm257_vm0, %v2535_v38  ;;  %v2033_v40 = vpop.f32.mrb[63].mxu0 }
 0x499   :  { %2086 = vst.msk [vmem:[%s3802_s19 + $0x8] sm:$0xff] %vm257_vm0, %v2033_v40 }
 0x49d   :  { %v2538_v6 = vpop.f32.mrb[64].mxu0 }
 0x49e   :  { %2091 = vst.msk [vmem:[%s3802_s19 + $0x30] sm:$0xff] %vm257_vm0, %v2538_v6  ;;  %v2046_v41 = vpop.f32.mrb[65].mxu0 }
 0x49f   :  { %2089 = vst.msk [vmem:[%s3802_s19 + $0x20] sm:$0xff] %vm257_vm0, %v2046_v41  ;;  %v2539_v43 = vpop.f32.mrb[66].mxu0 }
 0x4a0   :  { %2092 = vst.msk [vmem:[%s3802_s19 + $0x38] sm:$0xff] %vm257_vm0, %v2539_v43  ;;  %v2049_v14 = vpop.f32.mrb[67].mxu0 }
 0x4a1   :  { %2090 = vst.msk [vmem:[%s3802_s19 + $0x28] sm:$0xff] %vm257_vm0, %v2049_v14 }
 0x4a5   :  { %v2542_v19 = vpop.f32.mrb[68].mxu0 }
 0x4a6   :  { %2095 = vst.msk [vmem:[%s3802_s19 + $0x50] sm:$0xff] %vm257_vm0, %v2542_v19  ;;  %v2062_v13 = vpop.f32.mrb[69].mxu0 }
 0x4a7   :  { %2093 = vst.msk [vmem:[%s3802_s19 + $0x40] sm:$0xff] %vm257_vm0, %v2062_v13  ;;  %v2543_v15 = vpop.f32.mrb[70].mxu0 }
 0x4a8   :  { %2096 = vst.msk [vmem:[%s3802_s19 + $0x58] sm:$0xff] %vm257_vm0, %v2543_v15  ;;  %v2065_v18 = vpop.f32.mrb[71].mxu0 }
 0x4a9   :  { %2094 = vst.msk [vmem:[%s3802_s19 + $0x48] sm:$0xff] %vm257_vm0, %v2065_v18 }
 0x4b7   :  { %v1921_v20 = vpop.f32.mrb[20].mxu1 }
 0x4b8   :  { %2077 = vst [vmem:[#allocation23] sm:$0xff] %v1921_v20  ;;  %v1923_v21 = vpop.f32.mrb[21].mxu1 }
 0x4b9   :  { %2078 = vst [vmem:[#allocation23 + $0x8] sm:$0xff] %v1923_v21  ;;  %v1925_v24 = vpop.f32.mrb[22].mxu1 }
 0x4ba   :  { %2079 = vst [vmem:[#allocation23 + $0x10] sm:$0xff] %v1925_v24  ;;  %v1927_v28 = vpop.f32.mrb[23].mxu1 }
 0x4bb   :  { %2080 = vst [vmem:[#allocation23 + $0x18] sm:$0xff] %v1927_v28 }
 0x4bf   :  { %v1931_v33 = vpop.f32.mrb[24].mxu1 }
 0x4c0   :  { %2081 = vst [vmem:[#allocation23 + $0x20] sm:$0xff] %v1931_v33  ;;  %v1933_v34 = vpop.f32.mrb[25].mxu1 }
 0x4c1   :  { %2082 = vst [vmem:[#allocation23 + $0x28] sm:$0xff] %v1933_v34  ;;  %v1935_v4 = vpop.f32.mrb[26].mxu1 }
 0x4c2   :  { %2083 = vst [vmem:[#allocation23 + $0x30] sm:$0xff] %v1935_v4  ;;  %v1937_v10 = vpop.f32.mrb[27].mxu1 }
 0x4c3   :  { %2084 = vst [vmem:[#allocation23 + $0x38] sm:$0xff] %v1937_v10 }
 0x4c4   :  { %3066 = shalt.err (!%p3063_p10)
}
 0x4c5   :  { %s3803_s20 = sld [smem:[#allocation38_spill]] }
 0x4cb   :  { %s3067_s19 = scalar_lea.hbm %s3803_s20, 1024 }
 0x4cc   :  { %p3068_p11 = scmp.ne.s32.totalorder %s3803_s20, %s3067_s19  ;;  %p3071_p12 = scmp.lt.u32.totalorder %s3067_s19, %s3803_s20 }
 0x4ce   :  { %p3073_p13 = pnand %p3071_p12, %p3068_p11 }
 0x4d0   :  { %3076 = shalt.err (!%p3073_p13)
}
 0x4d1   :  { %2144 = dma.vmem_to_hbm [thread:$0]  %s2139_s15, 1024, %s3803_s20, [#allocation24], %s3104_s11, %s3104_s11, %s3105_s29  }
 0x4d2   :  { %3089 = dma.done.wait [#allocation4], 512  }
 0x4d3   :  { %3090 = vsyncadd [#allocation4], 4294966784 }
 0x4d4   :  { %3091 = dma.done.wait [#allocation21], 2048  }
 0x4d5   :  { %3092 = vsyncadd [#allocation21], 4294965248 }
 0x4d6   :  { %3093 = dma.done.wait [#allocation24], 1024  }
 0x4d7   :  { %3094 = vsyncadd [#allocation24], 4294966272 }
 0x4d8   :  { %2161 = vsyncpa [#allocation3], 1 }
 0x4d9   :  { %2162 = vsyncpa [#allocation6], 1 }
 0x4da   :  { %2163 = vsyncpa [#allocation9], 1 }
 0x4db   :  { %2164 = vsyncpa [#allocation12], 1 }
 0x4dc   :  { %2165 = vsyncpa [#allocation15], 1 }
 0x4dd   :  { %2166 = vsyncpa [#allocation18], 1 }
 0x4de   :  { %2167 = vsyncpa [#allocation4], 1 }
 0x4df   :  { %2168 = vsyncpa [#allocation21], 1 }
 0x4e0   :  { %2169 = vsyncpa [#allocation24], 1 }

</bundles_post_ra>
